<compile_context>
chip_gen: v6e
topology: v6e:2x2x1
jax: 0.10.0
libtpu: 0.0.40
codegen_flags: <defaults>
</compile_context>

<pallas_src>
import numpy as np
import jax
import jax.numpy as jnp
from jax import lax
from jax.experimental import pallas as pl
from jax.experimental.pallas import tpu as pltpu


def _wde_kernel(x_ref, lens_ref, needz_ref, h0_ref, c0_ref,
                w_in_ref, b_in_ref, w_hh_ref,
                w_hid_ref, b_hid_ref,
                ctx_ref, w_ctx_ref, b_ctx_ref,
                w_emb_h_ref, w_emb_c_ref, b_emb_ref,
                out_ref, gin_ref):
    Bt, L2 = h0_ref.shape          # (batch tile, 2L) packed state [fwd | bwd]
    L = L2 // 2
    G = 4 * L2                     # 8L gate width, per-gate interleaved layout
    TB = x_ref.shape[1]            # T * Bt (time-major rows, batch-minor)
    T = TB // Bt

    # ---- hoisted input projection: ONE (T*Bt, H) @ (H, 8L) MXU matmul --------
    gin_ref[...] = (jnp.dot(x_ref[0], w_in_ref[...],
                            preferred_element_type=jnp.float32)
                    + b_in_ref[...])

    w_hh = w_hh_ref[...]           # (2L, 8L) block-diagonal recurrent weight
    lens = lens_ref[...]           # (Bt, 1) int32 sequence lengths

    lane_g = lax.broadcasted_iota(jnp.int32, (1, G), 1)
    bwd_g = (lane_g % L2) >= L     # backward lanes inside an 8L gate row
    lane_s = lax.broadcasted_iota(jnp.int32, (1, L2), 1)
    bwd_s = lane_s >= L            # backward lanes of the packed state

    def body(k, carry):
        h, c, mx = carry           # each (Bt, 2L), fwd | bwd packed
        t_f = k                    # forward direction time index
        t_b = T - 1 - k            # backward direction time index
        # input-gate rows for both directions (fwd @ t_f, bwd @ t_b): one select
        g_in = jnp.where(bwd_g,
                         gin_ref[pl.ds(t_b * Bt, Bt)],
                         gin_ref[pl.ds(t_f * Bt, Bt)])
        # single fused recurrent matmul for both directions
        gates = g_in + jnp.dot(h, w_hh, preferred_element_type=jnp.float32)
        sig = jax.nn.sigmoid(gates)          # full-width EUP passes
        th = jnp.tanh(gates)
        i = sig[:, 0 * L2:1 * L2]            # PyTorch gate order i, f, g, o
        f = sig[:, 1 * L2:2 * L2]
        g = th[:, 2 * L2:3 * L2]
        o = sig[:, 3 * L2:4 * L2]
        c_new = f * c + i * g
        h_new = o * jnp.tanh(c_new)
        # pack_padded_sequence: state only advances on valid steps (per direction)
        t_lane = jnp.where(bwd_s, t_b, t_f)  # (1, 2L) int32
        valid = lens > t_lane                # (Bt, 2L) bool
        h = jnp.where(valid, h_new, h)
        c = jnp.where(valid, c_new, c)
        mx = jnp.where(valid, jnp.maximum(mx, h_new), mx)
        return h, c, mx

    neg_inf = jnp.full((Bt, L2), -jnp.inf, dtype=jnp.float32)
    _, _, mx = lax.fori_loop(0, T, body,
                             (h0_ref[...], c0_ref[...], neg_inf),
                             unroll=True)

    # pad_packed_sequence zero-pads rows past each length before F.max_pool2d, so
    # any sequence shorter than the batch max gets a 0 candidate in the time max.
    # (This also keeps zero-length / batch-padding rows finite: no -inf leaks.)
    pooled = jnp.where(needz_ref[...] > 0, jnp.maximum(mx, 0.0), mx)

    # tanh(hidden_layer(max-pooled biLSTM output)) -- [fwd|bwd] concat is already
    # the packed lane layout, so this is a single dot.
    hid = jnp.tanh(jnp.dot(pooled, w_hid_ref[...],
                           preferred_element_type=jnp.float32) + b_hid_ref[...])
    # tanh(context_input(context))
    ctx = jnp.tanh(jnp.dot(ctx_ref[...], w_ctx_ref[...],
                           preferred_element_type=jnp.float32) + b_ctx_ref[...])
    # tanh(embedding_layer(cat([hid, ctx]))) -- concat folded into split weights
    # (unaligned minor-dim concat avoided on purpose).
    out_ref[...] = jnp.tanh(
        jnp.dot(hid, w_emb_h_ref[...], preferred_element_type=jnp.float32)
        + jnp.dot(ctx, w_emb_c_ref[...], preferred_element_type=jnp.float32)
        + b_emb_ref[...])


def init_params(key, hidden_size, output_size, context_dim, vocab_size):
    H = hidden_size
    L = hidden_size  # module's dims require hidden_size == LSTM hidden (300 originally)
    ks = jax.random.split(key, 16)

    def rnd(k, shape, scale=0.1):
        return (scale * jax.random.normal(k, shape)).astype(jnp.float32)

    return {
        'embed': rnd(ks[0], (vocab_size, H), 1.0),
        # nn.LSTM(H, L, bidirectional=True), PyTorch layout (4L, in), gate order i,f,g,o
        'w_ih_f': rnd(ks[1], (4 * L, H)), 'w_hh_f': rnd(ks[2], (4 * L, L)),
        'b_ih_f': rnd(ks[3], (4 * L,)),   'b_hh_f': rnd(ks[4], (4 * L,)),
        'w_ih_b': rnd(ks[5], (4 * L, H)), 'w_hh_b': rnd(ks[6], (4 * L, L)),
        'b_ih_b': rnd(ks[7], (4 * L,)),   'b_hh_b': rnd(ks[8], (4 * L,)),
        # hidden_layer: Linear(2*H, H)
        'w_hid': rnd(ks[9], (H, 2 * L)), 'b_hid': rnd(ks[10], (H,)),
        # context_input: Linear(context_dim, 50)
        'w_ctx': rnd(ks[11], (50, context_dim)), 'b_ctx': rnd(ks[12], (50,)),
        # embedding_layer: Linear(50 + H, output_size), input order [hid | ctx]
        'w_emb': rnd(ks[13], (output_size, 50 + H)), 'b_emb': rnd(ks[14], (output_size,)),
    }


def wde_rnn_encoder_forward(params, inp, hidden, context_input):
    p = params
    B = inp.shape[0]
    T = inp.shape[1] - 2                         # STATIC padded sequence length
    H = p['w_hid'].shape[0]
    L = p['w_hh_f'].shape[1]
    OUT = p['w_emb'].shape[0]
    CTX = p['w_ctx'].shape[1]
    L2, G = 2 * L, 8 * L

    BT = 8                                       # batch tile (sublane multiple)
    B_pad = ((B + BT - 1) // BT) * BT
    nb = B_pad // BT
    TB = T * BT

    lengths = jnp.asarray(inp[:, 0], jnp.int32)
    # inp[:, 1] (batch_context) is read but never used in the PyTorch forward.
    idx = jnp.asarray(inp[:, 2:], jnp.int32)     # torch.sort + de-sort is a per-row no-op;
                                                 # the truncation to max length is handled by
                                                 # the validity masks + `needz` fix-up below.

    x = jnp.take(p['embed'], idx, axis=0).astype(jnp.float32)   # (B, T, H) gather glue
    x = jnp.pad(x, ((0, B_pad - B), (0, 0), (0, 0)))
    # tile layout (nb, T*BT, H): row t*BT + (b % BT) holds (batch b, time t)
    x = x.reshape(nb, BT, T, H).transpose(0, 2, 1, 3).reshape(nb, TB, H)

    lens_pad = jnp.pad(lengths, (0, B_pad - B)).reshape(B_pad, 1)
    # sequences shorter than the batch max pick up zero rows from pad_packed_sequence
    needz = (lens_pad < jnp.max(lengths)).astype(jnp.int32)

    h0, c0 = hidden
    # TODO(synk): PyTorch feeds `hidden` in un-sorted batch order to the length-sorted
    # packed sequence; initHidden() supplies zeros so that permutation quirk has no
    # effect and is not replicated here (non-zero initial states would diverge).
    h0p = jnp.pad(jnp.concatenate([h0[0], h0[1]], axis=1).astype(jnp.float32),
                  ((0, B_pad - B), (0, 0)))      # packed [fwd | bwd] (B_pad, 2L)
    c0p = jnp.pad(jnp.concatenate([c0[0], c0[1]], axis=1).astype(jnp.float32),
                  ((0, B_pad - B), (0, 0)))

    ctx = jnp.pad(context_input.reshape(B, CTX).astype(jnp.float32),
                  ((0, B_pad - B), (0, 0)))

    f32 = lambda a: jnp.asarray(a, jnp.float32)
    wif_T = f32(p['w_ih_f']).T                   # (H, 4L)
    wib_T = f32(p['w_ih_b']).T
    whf_T = f32(p['w_hh_f']).T                   # (L, 4L)
    whb_T = f32(p['w_hh_b']).T
    bf = f32(p['b_ih_f']) + f32(p['b_hh_f'])     # (4L,)
    bb = f32(p['b_ih_b']) + f32(p['b_hh_b'])

    # Build per-gate interleaved layouts: columns [i_f i_b | f_f f_b | g_f g_b | o_f o_b]
    zed = jnp.zeros((L, L), jnp.float32)
    w_in_cols, b_cols, w_hh_cols = [], [], []
    for gi in range(4):
        sl = slice(gi * L, (gi + 1) * L)
        w_in_cols += [wif_T[:, sl], wib_T[:, sl]]
        b_cols += [bf[sl], bb[sl]]
        w_hh_cols += [jnp.concatenate([whf_T[:, sl], zed], axis=0),
                      jnp.concatenate([zed, whb_T[:, sl]], axis=0)]
    w_in = jnp.concatenate(w_in_cols, axis=1)            # (H, 8L)
    b_in = jnp.concatenate(b_cols).reshape(1, G)         # (1, 8L)
    w_hh = jnp.concatenate(w_hh_cols, axis=1)            # (2L, 8L) block-diagonal

    w_hid_T = f32(p['w_hid']).T                          # (2L, H), rows = [fwd | bwd]
    w_ctx_T = f32(p['w_ctx']).T                          # (CTX, 50)
    w_emb_T = f32(p['w_emb']).T                          # (H + 50, OUT)
    row = lambda b_: f32(b_).reshape(1, -1)

    args = (x, lens_pad, needz, h0p, c0p,
            w_in, b_in, w_hh,
            w_hid_T, row(p['b_hid']),
            ctx, w_ctx_T, row(p['b_ctx']),
            w_emb_T[:H], w_emb_T[H:], row(p['b_emb']))

    rows_spec = lambda width: pl.BlockSpec((BT, width), lambda b: (b, 0))
    bcast2 = lambda shape: pl.BlockSpec(shape, lambda b: (0, 0))

    grid_spec = pltpu.PrefetchScalarGridSpec(
        num_scalar_prefetch=0,
        grid=(nb,),
        in_specs=[
            pl.BlockSpec((1, TB, H), lambda b: (b, 0, 0)),   # x (batch-tiled)
            rows_spec(1),                                    # lens
            rows_spec(1),                                    # needz
            rows_spec(L2),                                   # h0 packed
            rows_spec(L2),                                   # c0 packed
            bcast2((H, G)),                                  # w_in
            bcast2((1, G)),                                  # b_in
            bcast2((L2, G)),                                 # w_hh (block-diag)
            bcast2((L2, H)),                                 # w_hid
            bcast2((1, H)),                                  # b_hid
            rows_spec(CTX),                                  # ctx
            bcast2((CTX, 50)),                               # w_ctx
            bcast2((1, 50)),                                 # b_ctx
            bcast2((H, OUT)),                                # w_emb (hid part)
            bcast2((50, OUT)),                               # w_emb (ctx part)
            bcast2((1, OUT)),                                # b_emb
        ],
        out_specs=pl.BlockSpec((BT, OUT), lambda b: (b, 0)),
        scratch_shapes=[pltpu.VMEM((TB, G), jnp.float32)],   # hoisted input gates
    )

    out = pl.pallas_call(
        _wde_kernel,
        out_shape=jax.ShapeDtypeStruct((B_pad, OUT), jnp.float32),
        grid_spec=grid_spec,
        compiler_params=pltpu.CompilerParams(
            dimension_semantics=("parallel",)),
    )(*args)
    return out[:B].reshape(B, 1, OUT)


# ---------------- pure-numpy reference (mirrors the PyTorch forward) ----------
def _sigmoid(x):
    return 1.0 / (1.0 + np.exp(-x))


def reference_forward(params, inp, hidden, context_input):
    p = {k: np.asarray(v, np.float64) for k, v in params.items()}
    inp = np.asarray(inp)
    lengths = inp[:, 0].astype(np.int64)
    idx = inp[:, 2:].astype(np.int64)
    T = int(lengths.max())
    idx = idx[:, :T]
    B = idx.shape[0]
    L = p['w_hh_f'].shape[1]
    x = p['embed'][idx]                                  # (B, T, H)
    h0 = np.asarray(hidden[0], np.float64)
    c0 = np.asarray(hidden[1], np.float64)

    def cell(x_t, h, c, w_ih, w_hh, b_ih, b_hh):
        g = x_t @ w_ih.T + b_ih + h @ w_hh.T + b_hh
        i, f, gg, o = (_sigmoid(g[0:L]), _sigmoid(g[L:2 * L]),
                       np.tanh(g[2 * L:3 * L]), _sigmoid(g[3 * L:4 * L]))
        c = f * c + i * gg
        return o * np.tanh(c), c

    out_seq = np.zeros((B, T, 2 * L))
    for b in range(B):
        h, c = h0[0, b].copy(), c0[0, b].copy()
        for t in range(lengths[b]):
            h, c = cell(x[b, t], h, c, p['w_ih_f'], p['w_hh_f'],
                        p['b_ih_f'], p['b_hh_f'])
            out_seq[b, t, :L] = h
        h, c = h0[1, b].copy(), c0[1, b].copy()
        for t in range(int(lengths[b]) - 1, -1, -1):
            h, c = cell(x[b, t], h, c, p['w_ih_b'], p['w_hh_b'],
                        p['b_ih_b'], p['b_hh_b'])
            out_seq[b, t, L:] = h

    pooled = out_seq.max(axis=1)                         # F.max_pool2d over (T, 1)
    hid = np.tanh(pooled @ p['w_hid'].T + p['b_hid'])
    ctx = np.tanh(np.asarray(context_input, np.float64) @ p['w_ctx'].T + p['b_ctx'])
    out = np.tanh(np.concatenate([hid, ctx], axis=1) @ p['w_emb'].T + p['b_emb'])
    return out.reshape(B, 1, -1)


if __name__ == "__main__":
    HIDDEN = 32          # hidden_size (== LSTM hidden size, as the module's dims require)
    OUTPUT = 16
    CONTEXT_DIM = 50     # forced by context_input.view(B, 1, 50)
    VOCAB = 20
    B, T_PAD = 4, 8

    key = jax.random.PRNGKey(0)
    k_par, k_idx, k_ctx = jax.random.split(key, 3)
    params = init_params(k_par, HIDDEN, OUTPUT, CONTEXT_DIM, VOCAB)

    lengths = jnp.array([8, 5, 7, 3], dtype=jnp.int32)
    tokens = jax.random.randint(k_idx, (B, T_PAD), 0, VOCAB, dtype=jnp.int32)
    ctx_ids = jnp.zeros((B, 1), dtype=jnp.int32)            # input[:, 1], unused downstream
    inp = jnp.concatenate([lengths[:, None], ctx_ids, tokens], axis=1)  # (B, 2 + T)

    hidden = (jnp.zeros((2, B, HIDDEN), jnp.float32),        # initHidden(B)
              jnp.zeros((2, B, HIDDEN), jnp.float32))
    context = (0.5 * jax.random.normal(k_ctx, (B, CONTEXT_DIM))).astype(jnp.float32)

    fwd = jax.jit(wde_rnn_encoder_forward)                   # static T: no host syncs
    out = jax.block_until_ready(fwd(params, inp, hidden, context))

    ref = reference_forward(params, inp, hidden, context)
    np.testing.assert_allclose(np.asarray(out), ref, rtol=2e-3, atol=2e-3)
    print("KERNEL_OK")
</pallas_src>

<mosaic_0001>
module attributes {stable_mosaic.version = 11 : i64} {
  func.func @_wde_kernel(%arg0: i32, %arg1: memref<1x64x32xf32, #tpu.memory_space<vmem>>, %arg2: memref<8x1xi32, #tpu.memory_space<vmem>>, %arg3: memref<8x1xi32, #tpu.memory_space<vmem>>, %arg4: memref<8x64xf32, #tpu.memory_space<vmem>>, %arg5: memref<8x64xf32, #tpu.memory_space<vmem>>, %arg6: memref<32x256xf32, #tpu.memory_space<vmem>>, %arg7: memref<1x256xf32, #tpu.memory_space<vmem>>, %arg8: memref<64x256xf32, #tpu.memory_space<vmem>>, %arg9: memref<64x32xf32, #tpu.memory_space<vmem>>, %arg10: memref<1x32xf32, #tpu.memory_space<vmem>>, %arg11: memref<8x50xf32, #tpu.memory_space<vmem>>, %arg12: memref<50x50xf32, #tpu.memory_space<vmem>>, %arg13: memref<1x50xf32, #tpu.memory_space<vmem>>, %arg14: memref<32x16xf32, #tpu.memory_space<vmem>>, %arg15: memref<50x16xf32, #tpu.memory_space<vmem>>, %arg16: memref<1x16xf32, #tpu.memory_space<vmem>>, %arg17: memref<8x16xf32, #tpu.memory_space<vmem>>, %arg18: memref<64x256xf32, #tpu.memory_space<vmem>>) attributes {dimension_semantics = [#tpu.dimension_semantics<parallel>], iteration_bounds = array<i64: 1>, scalar_prefetch = 0 : i64, scratch_operands = 1 : i64, tpu.core_type = #tpu.core_type<tc>, window_params = [{transform_indices = @transform_0, window_bounds = array<i64: 1, 64, 32>}, {transform_indices = @transform_1, window_bounds = array<i64: 8, 1>}, {transform_indices = @transform_2, window_bounds = array<i64: 8, 1>}, {transform_indices = @transform_3, window_bounds = array<i64: 8, 64>}, {transform_indices = @transform_4, window_bounds = array<i64: 8, 64>}, {pipeline_mode = #tpu.pipeline_mode<synchronous>, transform_indices = @transform_5, window_bounds = array<i64: 32, 256>}, {pipeline_mode = #tpu.pipeline_mode<synchronous>, transform_indices = @transform_6, window_bounds = array<i64: 1, 256>}, {pipeline_mode = #tpu.pipeline_mode<synchronous>, transform_indices = @transform_7, window_bounds = array<i64: 64, 256>}, {pipeline_mode = #tpu.pipeline_mode<synchronous>, transform_indices = @transform_8, window_bounds = array<i64: 64, 32>}, {pipeline_mode = #tpu.pipeline_mode<synchronous>, transform_indices = @transform_9, window_bounds = array<i64: 1, 32>}, {transform_indices = @transform_10, window_bounds = array<i64: 8, 50>}, {pipeline_mode = #tpu.pipeline_mode<synchronous>, transform_indices = @transform_11, window_bounds = array<i64: 50, 50>}, {pipeline_mode = #tpu.pipeline_mode<synchronous>, transform_indices = @transform_12, window_bounds = array<i64: 1, 50>}, {pipeline_mode = #tpu.pipeline_mode<synchronous>, transform_indices = @transform_13, window_bounds = array<i64: 32, 16>}, {pipeline_mode = #tpu.pipeline_mode<synchronous>, transform_indices = @transform_14, window_bounds = array<i64: 50, 16>}, {pipeline_mode = #tpu.pipeline_mode<synchronous>, transform_indices = @transform_15, window_bounds = array<i64: 1, 16>}, {transform_indices = @transform_16, window_bounds = array<i64: 8, 16>}]} {
    %c0 = arith.constant 0 : index
    %c0_0 = arith.constant 0 : index
    %c0_1 = arith.constant 0 : index
    %0 = vector.load %arg1[%c0, %c0_0, %c0_1] : memref<1x64x32xf32, #tpu.memory_space<vmem>>, vector<1x64x32xf32>
    %1 = vector.shape_cast %0 : vector<1x64x32xf32> to vector<64x32xf32>
    %c0_2 = arith.constant 0 : index
    %c0_3 = arith.constant 0 : index
    %2 = vector.load %arg6[%c0_2, %c0_3] : memref<32x256xf32, #tpu.memory_space<vmem>>, vector<32x256xf32>
    %cst = arith.constant dense<0.000000e+00> : vector<64x256xf32>
    %3 = tpu.matmul %1, %2, %cst {dimension_numbers = #tpu.dot_dimension_numbers<[1], [0], [0], [1], [0, 0, 1, 1], [], []>} : vector<64x32xf32>, vector<32x256xf32>, vector<64x256xf32> -> vector<64x256xf32>
    %c0_4 = arith.constant 0 : index
    %c0_5 = arith.constant 0 : index
    %4 = vector.load %arg7[%c0_4, %c0_5] : memref<1x256xf32, #tpu.memory_space<vmem>>, vector<1x256xf32>
    %5 = vector.broadcast %4 : vector<1x256xf32> to vector<64x256xf32>
    %6 = arith.addf %3, %5 : vector<64x256xf32>
    %c0_6 = arith.constant 0 : index
    %c0_7 = arith.constant 0 : index
    %7 = vector.load %arg18[%c0_6, %c0_7] : memref<64x256xf32, #tpu.memory_space<vmem>>, vector<64x256xf32>
    tpu.vector_store %arg18[%c0_6, %c0_7], %6 {strides = array<i32>} : memref<64x256xf32, #tpu.memory_space<vmem>>, vector<64x256xf32>,
    %c0_8 = arith.constant 0 : index
    %c0_9 = arith.constant 0 : index
    %8 = vector.load %arg8[%c0_8, %c0_9] : memref<64x256xf32, #tpu.memory_space<vmem>>, vector<64x256xf32>
    %c0_10 = arith.constant 0 : index
    %c0_11 = arith.constant 0 : index
    %9 = vector.load %arg2[%c0_10, %c0_11] : memref<8x1xi32, #tpu.memory_space<vmem>>, vector<8x1xi32>
    %10 = tpu.iota {dimensions = array<i32: 1>} : vector<1x256xi32>
    %c64_i32 = arith.constant 64 : i32
    %c0_i32 = arith.constant 0 : i32
    %11 = arith.cmpi eq, %c64_i32, %c0_i32 : i32
    %c1_i32 = arith.constant 1 : i32
    %12 = arith.select %11, %c1_i32, %c64_i32 : i32
    %13 = vector.broadcast %12 : i32 to vector<1x256xi32>
    %14 = arith.remsi %10, %13 : vector<1x256xi32>
    %c0_i32_12 = arith.constant 0 : i32
    %15 = vector.broadcast %c0_i32_12 : i32 to vector<1x256xi32>
    %16 = arith.cmpi ne, %14, %15 : vector<1x256xi32>
    %c0_i32_13 = arith.constant 0 : i32
    %17 = vector.broadcast %c0_i32_13 : i32 to vector<1x256xi32>
    %18 = arith.cmpi slt, %14, %17 : vector<1x256xi32>
    %c0_i32_14 = arith.constant 0 : i32
    %19 = arith.cmpi slt, %12, %c0_i32_14 : i32
    %20 = vector.broadcast %19 : i1 to vector<1x256xi1>
    %21 = vector.broadcast %20 : vector<1x256xi1> to vector<1x256xi1>
    %22 = arith.xori %18, %21 : vector<1x256xi1>
    %23 = arith.andi %22, %16 : vector<1x256xi1>
    %24 = vector.broadcast %12 : i32 to vector<1x256xi32>
    %25 = arith.addi %14, %24 : vector<1x256xi32>
    %26 = arith.select %23, %25, %14 : vector<1x256xi1>, vector<1x256xi32>
    %c32_i32 = arith.constant 32 : i32
    %27 = vector.broadcast %c32_i32 : i32 to vector<1x256xi32>
    %28 = arith.cmpi sge, %26, %27 : vector<1x256xi32>
    %29 = tpu.iota {dimensions = array<i32: 1>} : vector<1x64xi32>
    %c32_i32_15 = arith.constant 32 : i32
    %30 = vector.broadcast %c32_i32_15 : i32 to vector<1x64xi32>
    %31 = arith.cmpi sge, %29, %30 : vector<1x64xi32>
    %cst_16 = arith.constant 0xFF800000 : f32
    %32 = vector.broadcast %cst_16 : f32 to vector<8x64xf32>
    %c0_17 = arith.constant 0 : index
    %c0_18 = arith.constant 0 : index
    %33 = vector.load %arg4[%c0_17, %c0_18] : memref<8x64xf32, #tpu.memory_space<vmem>>, vector<8x64xf32>
    %c0_19 = arith.constant 0 : index
    %c0_20 = arith.constant 0 : index
    %34 = vector.load %arg5[%c0_19, %c0_20] : memref<8x64xf32, #tpu.memory_space<vmem>>, vector<8x64xf32>
    %c0_i32_21 = arith.constant 0 : i32
    %c7_i32 = arith.constant 7 : i32
    %35 = arith.subi %c7_i32, %c0_i32_21 : i32
    %c8_i32 = arith.constant 8 : i32
    %36 = arith.muli %35, %c8_i32 : i32
    %37 = arith.index_cast %36 : i32 to index
    %c0_22 = arith.constant 0 : index
    %38 = vector.load %arg18[%37, %c0_22] : memref<64x256xf32, #tpu.memory_space<vmem>>, vector<8x256xf32>
    %c8_i32_23 = arith.constant 8 : i32
    %39 = arith.muli %c0_i32_21, %c8_i32_23 : i32
    %40 = arith.index_cast %39 : i32 to index
    %c0_24 = arith.constant 0 : index
    %41 = vector.load %arg18[%40, %c0_24] : memref<64x256xf32, #tpu.memory_space<vmem>>, vector<8x256xf32>
    %42 = vector.shape_cast %28 : vector<1x256xi1> to vector<1x256xi1>
    %43 = vector.broadcast %42 : vector<1x256xi1> to vector<8x256xi1>
    %44 = arith.select %43, %38, %41 : vector<8x256xi1>, vector<8x256xf32>
    %cst_25 = arith.constant dense<0.000000e+00> : vector<8x256xf32>
    %45 = tpu.matmul %33, %8, %cst_25 {dimension_numbers = #tpu.dot_dimension_numbers<[1], [0], [0], [1], [0, 0, 1, 1], [], []>} : vector<8x64xf32>, vector<64x256xf32>, vector<8x256xf32> -> vector<8x256xf32>
    %46 = arith.addf %44, %45 : vector<8x256xf32>
    %47 = arith.negf %46 : vector<8x256xf32>
    %48 = math.exp %47 : vector<8x256xf32>
    %cst_26 = arith.constant 1.000000e+00 : f32
    %49 = vector.broadcast %cst_26 : f32 to vector<8x256xf32>
    %50 = arith.addf %49, %48 : vector<8x256xf32>
    %51 = arith.divf %49, %50 : vector<8x256xf32>
    %52 = math.tanh %46 : vector<8x256xf32>
    %53 = vector.extract_strided_slice %51 {offsets = [0, 0], sizes = [8, 64], strides = [1, 1]} : vector<8x256xf32> to vector<8x64xf32>
    %54 = vector.extract_strided_slice %51 {offsets = [0, 64], sizes = [8, 64], strides = [1, 1]} : vector<8x256xf32> to vector<8x64xf32>
    %55 = vector.extract_strided_slice %52 {offsets = [0, 128], sizes = [8, 64], strides = [1, 1]} : vector<8x256xf32> to vector<8x64xf32>
    %56 = vector.extract_strided_slice %51 {offsets = [0, 192], sizes = [8, 64], strides = [1, 1]} : vector<8x256xf32> to vector<8x64xf32>
    %57 = arith.mulf %54, %34 : vector<8x64xf32>
    %58 = arith.mulf %53, %55 : vector<8x64xf32>
    %59 = arith.addf %57, %58 : vector<8x64xf32>
    %60 = math.tanh %59 : vector<8x64xf32>
    %61 = arith.mulf %56, %60 : vector<8x64xf32>
    %62 = vector.broadcast %35 : i32 to vector<1x64xi32>
    %63 = vector.broadcast %c0_i32_21 : i32 to vector<1x64xi32>
    %64 = arith.select %31, %62, %63 : vector<1x64xi1>, vector<1x64xi32>
    %65 = vector.broadcast %9 : vector<8x1xi32> to vector<8x64xi32>
    %66 = vector.broadcast %64 : vector<1x64xi32> to vector<8x64xi32>
    %67 = arith.cmpi sgt, %65, %66 : vector<8x64xi32>
    %68 = arith.select %67, %61, %33 : vector<8x64xi1>, vector<8x64xf32>
    %69 = arith.select %67, %59, %34 : vector<8x64xi1>, vector<8x64xf32>
    %70 = arith.maximumf %32, %61 : vector<8x64xf32>
    %71 = arith.select %67, %70, %32 : vector<8x64xi1>, vector<8x64xf32>
    %c1_i32_27 = arith.constant 1 : i32
    %c7_i32_28 = arith.constant 7 : i32
    %72 = arith.subi %c7_i32_28, %c1_i32_27 : i32
    %c8_i32_29 = arith.constant 8 : i32
    %73 = arith.muli %72, %c8_i32_29 : i32
    %74 = arith.index_cast %73 : i32 to index
    %c0_30 = arith.constant 0 : index
    %75 = vector.load %arg18[%74, %c0_30] : memref<64x256xf32, #tpu.memory_space<vmem>>, vector<8x256xf32>
    %c8_i32_31 = arith.constant 8 : i32
    %76 = arith.muli %c1_i32_27, %c8_i32_31 : i32
    %77 = arith.index_cast %76 : i32 to index
    %c0_32 = arith.constant 0 : index
    %78 = vector.load %arg18[%77, %c0_32] : memref<64x256xf32, #tpu.memory_space<vmem>>, vector<8x256xf32>
    %79 = vector.shape_cast %28 : vector<1x256xi1> to vector<1x256xi1>
    %80 = vector.broadcast %79 : vector<1x256xi1> to vector<8x256xi1>
    %81 = arith.select %80, %75, %78 : vector<8x256xi1>, vector<8x256xf32>
    %cst_33 = arith.constant dense<0.000000e+00> : vector<8x256xf32>
    %82 = tpu.matmul %68, %8, %cst_33 {dimension_numbers = #tpu.dot_dimension_numbers<[1], [0], [0], [1], [0, 0, 1, 1], [], []>} : vector<8x64xf32>, vector<64x256xf32>, vector<8x256xf32> -> vector<8x256xf32>
    %83 = arith.addf %81, %82 : vector<8x256xf32>
    %84 = arith.negf %83 : vector<8x256xf32>
    %85 = math.exp %84 : vector<8x256xf32>
    %cst_34 = arith.constant 1.000000e+00 : f32
    %86 = vector.broadcast %cst_34 : f32 to vector<8x256xf32>
    %87 = arith.addf %86, %85 : vector<8x256xf32>
    %88 = arith.divf %86, %87 : vector<8x256xf32>
    %89 = math.tanh %83 : vector<8x256xf32>
    %90 = vector.extract_strided_slice %88 {offsets = [0, 0], sizes = [8, 64], strides = [1, 1]} : vector<8x256xf32> to vector<8x64xf32>
    %91 = vector.extract_strided_slice %88 {offsets = [0, 64], sizes = [8, 64], strides = [1, 1]} : vector<8x256xf32> to vector<8x64xf32>
    %92 = vector.extract_strided_slice %89 {offsets = [0, 128], sizes = [8, 64], strides = [1, 1]} : vector<8x256xf32> to vector<8x64xf32>
    %93 = vector.extract_strided_slice %88 {offsets = [0, 192], sizes = [8, 64], strides = [1, 1]} : vector<8x256xf32> to vector<8x64xf32>
    %94 = arith.mulf %91, %69 : vector<8x64xf32>
    %95 = arith.mulf %90, %92 : vector<8x64xf32>
    %96 = arith.addf %94, %95 : vector<8x64xf32>
    %97 = math.tanh %96 : vector<8x64xf32>
    %98 = arith.mulf %93, %97 : vector<8x64xf32>
    %99 = vector.broadcast %72 : i32 to vector<1x64xi32>
    %100 = vector.broadcast %c1_i32_27 : i32 to vector<1x64xi32>
    %101 = arith.select %31, %99, %100 : vector<1x64xi1>, vector<1x64xi32>
    %102 = vector.broadcast %9 : vector<8x1xi32> to vector<8x64xi32>
    %103 = vector.broadcast %101 : vector<1x64xi32> to vector<8x64xi32>
    %104 = arith.cmpi sgt, %102, %103 : vector<8x64xi32>
    %105 = arith.select %104, %98, %68 : vector<8x64xi1>, vector<8x64xf32>
    %106 = arith.select %104, %96, %69 : vector<8x64xi1>, vector<8x64xf32>
    %107 = arith.maximumf %71, %98 : vector<8x64xf32>
    %108 = arith.select %104, %107, %71 : vector<8x64xi1>, vector<8x64xf32>
    %c2_i32 = arith.constant 2 : i32
    %c7_i32_35 = arith.constant 7 : i32
    %109 = arith.subi %c7_i32_35, %c2_i32 : i32
    %c8_i32_36 = arith.constant 8 : i32
    %110 = arith.muli %109, %c8_i32_36 : i32
    %111 = arith.index_cast %110 : i32 to index
    %c0_37 = arith.constant 0 : index
    %112 = vector.load %arg18[%111, %c0_37] : memref<64x256xf32, #tpu.memory_space<vmem>>, vector<8x256xf32>
    %c8_i32_38 = arith.constant 8 : i32
    %113 = arith.muli %c2_i32, %c8_i32_38 : i32
    %114 = arith.index_cast %113 : i32 to index
    %c0_39 = arith.constant 0 : index
    %115 = vector.load %arg18[%114, %c0_39] : memref<64x256xf32, #tpu.memory_space<vmem>>, vector<8x256xf32>
    %116 = vector.shape_cast %28 : vector<1x256xi1> to vector<1x256xi1>
    %117 = vector.broadcast %116 : vector<1x256xi1> to vector<8x256xi1>
    %118 = arith.select %117, %112, %115 : vector<8x256xi1>, vector<8x256xf32>
    %cst_40 = arith.constant dense<0.000000e+00> : vector<8x256xf32>
    %119 = tpu.matmul %105, %8, %cst_40 {dimension_numbers = #tpu.dot_dimension_numbers<[1], [0], [0], [1], [0, 0, 1, 1], [], []>} : vector<8x64xf32>, vector<64x256xf32>, vector<8x256xf32> -> vector<8x256xf32>
    %120 = arith.addf %118, %119 : vector<8x256xf32>
    %121 = arith.negf %120 : vector<8x256xf32>
    %122 = math.exp %121 : vector<8x256xf32>
    %cst_41 = arith.constant 1.000000e+00 : f32
    %123 = vector.broadcast %cst_41 : f32 to vector<8x256xf32>
    %124 = arith.addf %123, %122 : vector<8x256xf32>
    %125 = arith.divf %123, %124 : vector<8x256xf32>
    %126 = math.tanh %120 : vector<8x256xf32>
    %127 = vector.extract_strided_slice %125 {offsets = [0, 0], sizes = [8, 64], strides = [1, 1]} : vector<8x256xf32> to vector<8x64xf32>
    %128 = vector.extract_strided_slice %125 {offsets = [0, 64], sizes = [8, 64], strides = [1, 1]} : vector<8x256xf32> to vector<8x64xf32>
    %129 = vector.extract_strided_slice %126 {offsets = [0, 128], sizes = [8, 64], strides = [1, 1]} : vector<8x256xf32> to vector<8x64xf32>
    %130 = vector.extract_strided_slice %125 {offsets = [0, 192], sizes = [8, 64], strides = [1, 1]} : vector<8x256xf32> to vector<8x64xf32>
    %131 = arith.mulf %128, %106 : vector<8x64xf32>
    %132 = arith.mulf %127, %129 : vector<8x64xf32>
    %133 = arith.addf %131, %132 : vector<8x64xf32>
    %134 = math.tanh %133 : vector<8x64xf32>
    %135 = arith.mulf %130, %134 : vector<8x64xf32>
    %136 = vector.broadcast %109 : i32 to vector<1x64xi32>
    %137 = vector.broadcast %c2_i32 : i32 to vector<1x64xi32>
    %138 = arith.select %31, %136, %137 : vector<1x64xi1>, vector<1x64xi32>
    %139 = vector.broadcast %9 : vector<8x1xi32> to vector<8x64xi32>
    %140 = vector.broadcast %138 : vector<1x64xi32> to vector<8x64xi32>
    %141 = arith.cmpi sgt, %139, %140 : vector<8x64xi32>
    %142 = arith.select %141, %135, %105 : vector<8x64xi1>, vector<8x64xf32>
    %143 = arith.select %141, %133, %106 : vector<8x64xi1>, vector<8x64xf32>
    %144 = arith.maximumf %108, %135 : vector<8x64xf32>
    %145 = arith.select %141, %144, %108 : vector<8x64xi1>, vector<8x64xf32>
    %c3_i32 = arith.constant 3 : i32
    %c7_i32_42 = arith.constant 7 : i32
    %146 = arith.subi %c7_i32_42, %c3_i32 : i32
    %c8_i32_43 = arith.constant 8 : i32
    %147 = arith.muli %146, %c8_i32_43 : i32
    %148 = arith.index_cast %147 : i32 to index
    %c0_44 = arith.constant 0 : index
    %149 = vector.load %arg18[%148, %c0_44] : memref<64x256xf32, #tpu.memory_space<vmem>>, vector<8x256xf32>
    %c8_i32_45 = arith.constant 8 : i32
    %150 = arith.muli %c3_i32, %c8_i32_45 : i32
    %151 = arith.index_cast %150 : i32 to index
    %c0_46 = arith.constant 0 : index
    %152 = vector.load %arg18[%151, %c0_46] : memref<64x256xf32, #tpu.memory_space<vmem>>, vector<8x256xf32>
    %153 = vector.shape_cast %28 : vector<1x256xi1> to vector<1x256xi1>
    %154 = vector.broadcast %153 : vector<1x256xi1> to vector<8x256xi1>
    %155 = arith.select %154, %149, %152 : vector<8x256xi1>, vector<8x256xf32>
    %cst_47 = arith.constant dense<0.000000e+00> : vector<8x256xf32>
    %156 = tpu.matmul %142, %8, %cst_47 {dimension_numbers = #tpu.dot_dimension_numbers<[1], [0], [0], [1], [0, 0, 1, 1], [], []>} : vector<8x64xf32>, vector<64x256xf32>, vector<8x256xf32> -> vector<8x256xf32>
    %157 = arith.addf %155, %156 : vector<8x256xf32>
    %158 = arith.negf %157 : vector<8x256xf32>
    %159 = math.exp %158 : vector<8x256xf32>
    %cst_48 = arith.constant 1.000000e+00 : f32
    %160 = vector.broadcast %cst_48 : f32 to vector<8x256xf32>
    %161 = arith.addf %160, %159 : vector<8x256xf32>
    %162 = arith.divf %160, %161 : vector<8x256xf32>
    %163 = math.tanh %157 : vector<8x256xf32>
    %164 = vector.extract_strided_slice %162 {offsets = [0, 0], sizes = [8, 64], strides = [1, 1]} : vector<8x256xf32> to vector<8x64xf32>
    %165 = vector.extract_strided_slice %162 {offsets = [0, 64], sizes = [8, 64], strides = [1, 1]} : vector<8x256xf32> to vector<8x64xf32>
    %166 = vector.extract_strided_slice %163 {offsets = [0, 128], sizes = [8, 64], strides = [1, 1]} : vector<8x256xf32> to vector<8x64xf32>
    %167 = vector.extract_strided_slice %162 {offsets = [0, 192], sizes = [8, 64], strides = [1, 1]} : vector<8x256xf32> to vector<8x64xf32>
    %168 = arith.mulf %165, %143 : vector<8x64xf32>
    %169 = arith.mulf %164, %166 : vector<8x64xf32>
    %170 = arith.addf %168, %169 : vector<8x64xf32>
    %171 = math.tanh %170 : vector<8x64xf32>
    %172 = arith.mulf %167, %171 : vector<8x64xf32>
    %173 = vector.broadcast %146 : i32 to vector<1x64xi32>
    %174 = vector.broadcast %c3_i32 : i32 to vector<1x64xi32>
    %175 = arith.select %31, %173, %174 : vector<1x64xi1>, vector<1x64xi32>
    %176 = vector.broadcast %9 : vector<8x1xi32> to vector<8x64xi32>
    %177 = vector.broadcast %175 : vector<1x64xi32> to vector<8x64xi32>
    %178 = arith.cmpi sgt, %176, %177 : vector<8x64xi32>
    %179 = arith.select %178, %172, %142 : vector<8x64xi1>, vector<8x64xf32>
    %180 = arith.select %178, %170, %143 : vector<8x64xi1>, vector<8x64xf32>
    %181 = arith.maximumf %145, %172 : vector<8x64xf32>
    %182 = arith.select %178, %181, %145 : vector<8x64xi1>, vector<8x64xf32>
    %c4_i32 = arith.constant 4 : i32
    %c7_i32_49 = arith.constant 7 : i32
    %183 = arith.subi %c7_i32_49, %c4_i32 : i32
    %c8_i32_50 = arith.constant 8 : i32
    %184 = arith.muli %183, %c8_i32_50 : i32
    %185 = arith.index_cast %184 : i32 to index
    %c0_51 = arith.constant 0 : index
    %186 = vector.load %arg18[%185, %c0_51] : memref<64x256xf32, #tpu.memory_space<vmem>>, vector<8x256xf32>
    %c8_i32_52 = arith.constant 8 : i32
    %187 = arith.muli %c4_i32, %c8_i32_52 : i32
    %188 = arith.index_cast %187 : i32 to index
    %c0_53 = arith.constant 0 : index
    %189 = vector.load %arg18[%188, %c0_53] : memref<64x256xf32, #tpu.memory_space<vmem>>, vector<8x256xf32>
    %190 = vector.shape_cast %28 : vector<1x256xi1> to vector<1x256xi1>
    %191 = vector.broadcast %190 : vector<1x256xi1> to vector<8x256xi1>
    %192 = arith.select %191, %186, %189 : vector<8x256xi1>, vector<8x256xf32>
    %cst_54 = arith.constant dense<0.000000e+00> : vector<8x256xf32>
    %193 = tpu.matmul %179, %8, %cst_54 {dimension_numbers = #tpu.dot_dimension_numbers<[1], [0], [0], [1], [0, 0, 1, 1], [], []>} : vector<8x64xf32>, vector<64x256xf32>, vector<8x256xf32> -> vector<8x256xf32>
    %194 = arith.addf %192, %193 : vector<8x256xf32>
    %195 = arith.negf %194 : vector<8x256xf32>
    %196 = math.exp %195 : vector<8x256xf32>
    %cst_55 = arith.constant 1.000000e+00 : f32
    %197 = vector.broadcast %cst_55 : f32 to vector<8x256xf32>
    %198 = arith.addf %197, %196 : vector<8x256xf32>
    %199 = arith.divf %197, %198 : vector<8x256xf32>
    %200 = math.tanh %194 : vector<8x256xf32>
    %201 = vector.extract_strided_slice %199 {offsets = [0, 0], sizes = [8, 64], strides = [1, 1]} : vector<8x256xf32> to vector<8x64xf32>
    %202 = vector.extract_strided_slice %199 {offsets = [0, 64], sizes = [8, 64], strides = [1, 1]} : vector<8x256xf32> to vector<8x64xf32>
    %203 = vector.extract_strided_slice %200 {offsets = [0, 128], sizes = [8, 64], strides = [1, 1]} : vector<8x256xf32> to vector<8x64xf32>
    %204 = vector.extract_strided_slice %199 {offsets = [0, 192], sizes = [8, 64], strides = [1, 1]} : vector<8x256xf32> to vector<8x64xf32>
    %205 = arith.mulf %202, %180 : vector<8x64xf32>
    %206 = arith.mulf %201, %203 : vector<8x64xf32>
    %207 = arith.addf %205, %206 : vector<8x64xf32>
    %208 = math.tanh %207 : vector<8x64xf32>
    %209 = arith.mulf %204, %208 : vector<8x64xf32>
    %210 = vector.broadcast %183 : i32 to vector<1x64xi32>
    %211 = vector.broadcast %c4_i32 : i32 to vector<1x64xi32>
    %212 = arith.select %31, %210, %211 : vector<1x64xi1>, vector<1x64xi32>
    %213 = vector.broadcast %9 : vector<8x1xi32> to vector<8x64xi32>
    %214 = vector.broadcast %212 : vector<1x64xi32> to vector<8x64xi32>
    %215 = arith.cmpi sgt, %213, %214 : vector<8x64xi32>
    %216 = arith.select %215, %209, %179 : vector<8x64xi1>, vector<8x64xf32>
    %217 = arith.select %215, %207, %180 : vector<8x64xi1>, vector<8x64xf32>
    %218 = arith.maximumf %182, %209 : vector<8x64xf32>
    %219 = arith.select %215, %218, %182 : vector<8x64xi1>, vector<8x64xf32>
    %c5_i32 = arith.constant 5 : i32
    %c7_i32_56 = arith.constant 7 : i32
    %220 = arith.subi %c7_i32_56, %c5_i32 : i32
    %c8_i32_57 = arith.constant 8 : i32
    %221 = arith.muli %220, %c8_i32_57 : i32
    %222 = arith.index_cast %221 : i32 to index
    %c0_58 = arith.constant 0 : index
    %223 = vector.load %arg18[%222, %c0_58] : memref<64x256xf32, #tpu.memory_space<vmem>>, vector<8x256xf32>
    %c8_i32_59 = arith.constant 8 : i32
    %224 = arith.muli %c5_i32, %c8_i32_59 : i32
    %225 = arith.index_cast %224 : i32 to index
    %c0_60 = arith.constant 0 : index
    %226 = vector.load %arg18[%225, %c0_60] : memref<64x256xf32, #tpu.memory_space<vmem>>, vector<8x256xf32>
    %227 = vector.shape_cast %28 : vector<1x256xi1> to vector<1x256xi1>
    %228 = vector.broadcast %227 : vector<1x256xi1> to vector<8x256xi1>
    %229 = arith.select %228, %223, %226 : vector<8x256xi1>, vector<8x256xf32>
    %cst_61 = arith.constant dense<0.000000e+00> : vector<8x256xf32>
    %230 = tpu.matmul %216, %8, %cst_61 {dimension_numbers = #tpu.dot_dimension_numbers<[1], [0], [0], [1], [0, 0, 1, 1], [], []>} : vector<8x64xf32>, vector<64x256xf32>, vector<8x256xf32> -> vector<8x256xf32>
    %231 = arith.addf %229, %230 : vector<8x256xf32>
    %232 = arith.negf %231 : vector<8x256xf32>
    %233 = math.exp %232 : vector<8x256xf32>
    %cst_62 = arith.constant 1.000000e+00 : f32
    %234 = vector.broadcast %cst_62 : f32 to vector<8x256xf32>
    %235 = arith.addf %234, %233 : vector<8x256xf32>
    %236 = arith.divf %234, %235 : vector<8x256xf32>
    %237 = math.tanh %231 : vector<8x256xf32>
    %238 = vector.extract_strided_slice %236 {offsets = [0, 0], sizes = [8, 64], strides = [1, 1]} : vector<8x256xf32> to vector<8x64xf32>
    %239 = vector.extract_strided_slice %236 {offsets = [0, 64], sizes = [8, 64], strides = [1, 1]} : vector<8x256xf32> to vector<8x64xf32>
    %240 = vector.extract_strided_slice %237 {offsets = [0, 128], sizes = [8, 64], strides = [1, 1]} : vector<8x256xf32> to vector<8x64xf32>
    %241 = vector.extract_strided_slice %236 {offsets = [0, 192], sizes = [8, 64], strides = [1, 1]} : vector<8x256xf32> to vector<8x64xf32>
    %242 = arith.mulf %239, %217 : vector<8x64xf32>
    %243 = arith.mulf %238, %240 : vector<8x64xf32>
    %244 = arith.addf %242, %243 : vector<8x64xf32>
    %245 = math.tanh %244 : vector<8x64xf32>
    %246 = arith.mulf %241, %245 : vector<8x64xf32>
    %247 = vector.broadcast %220 : i32 to vector<1x64xi32>
    %248 = vector.broadcast %c5_i32 : i32 to vector<1x64xi32>
    %249 = arith.select %31, %247, %248 : vector<1x64xi1>, vector<1x64xi32>
    %250 = vector.broadcast %9 : vector<8x1xi32> to vector<8x64xi32>
    %251 = vector.broadcast %249 : vector<1x64xi32> to vector<8x64xi32>
    %252 = arith.cmpi sgt, %250, %251 : vector<8x64xi32>
    %253 = arith.select %252, %246, %216 : vector<8x64xi1>, vector<8x64xf32>
    %254 = arith.select %252, %244, %217 : vector<8x64xi1>, vector<8x64xf32>
    %255 = arith.maximumf %219, %246 : vector<8x64xf32>
    %256 = arith.select %252, %255, %219 : vector<8x64xi1>, vector<8x64xf32>
    %c6_i32 = arith.constant 6 : i32
    %c7_i32_63 = arith.constant 7 : i32
    %257 = arith.subi %c7_i32_63, %c6_i32 : i32
    %c8_i32_64 = arith.constant 8 : i32
    %258 = arith.muli %257, %c8_i32_64 : i32
    %259 = arith.index_cast %258 : i32 to index
    %c0_65 = arith.constant 0 : index
    %260 = vector.load %arg18[%259, %c0_65] : memref<64x256xf32, #tpu.memory_space<vmem>>, vector<8x256xf32>
    %c8_i32_66 = arith.constant 8 : i32
    %261 = arith.muli %c6_i32, %c8_i32_66 : i32
    %262 = arith.index_cast %261 : i32 to index
    %c0_67 = arith.constant 0 : index
    %263 = vector.load %arg18[%262, %c0_67] : memref<64x256xf32, #tpu.memory_space<vmem>>, vector<8x256xf32>
    %264 = vector.shape_cast %28 : vector<1x256xi1> to vector<1x256xi1>
    %265 = vector.broadcast %264 : vector<1x256xi1> to vector<8x256xi1>
    %266 = arith.select %265, %260, %263 : vector<8x256xi1>, vector<8x256xf32>
    %cst_68 = arith.constant dense<0.000000e+00> : vector<8x256xf32>
    %267 = tpu.matmul %253, %8, %cst_68 {dimension_numbers = #tpu.dot_dimension_numbers<[1], [0], [0], [1], [0, 0, 1, 1], [], []>} : vector<8x64xf32>, vector<64x256xf32>, vector<8x256xf32> -> vector<8x256xf32>
    %268 = arith.addf %266, %267 : vector<8x256xf32>
    %269 = arith.negf %268 : vector<8x256xf32>
    %270 = math.exp %269 : vector<8x256xf32>
    %cst_69 = arith.constant 1.000000e+00 : f32
    %271 = vector.broadcast %cst_69 : f32 to vector<8x256xf32>
    %272 = arith.addf %271, %270 : vector<8x256xf32>
    %273 = arith.divf %271, %272 : vector<8x256xf32>
    %274 = math.tanh %268 : vector<8x256xf32>
    %275 = vector.extract_strided_slice %273 {offsets = [0, 0], sizes = [8, 64], strides = [1, 1]} : vector<8x256xf32> to vector<8x64xf32>
    %276 = vector.extract_strided_slice %273 {offsets = [0, 64], sizes = [8, 64], strides = [1, 1]} : vector<8x256xf32> to vector<8x64xf32>
    %277 = vector.extract_strided_slice %274 {offsets = [0, 128], sizes = [8, 64], strides = [1, 1]} : vector<8x256xf32> to vector<8x64xf32>
    %278 = vector.extract_strided_slice %273 {offsets = [0, 192], sizes = [8, 64], strides = [1, 1]} : vector<8x256xf32> to vector<8x64xf32>
    %279 = arith.mulf %276, %254 : vector<8x64xf32>
    %280 = arith.mulf %275, %277 : vector<8x64xf32>
    %281 = arith.addf %279, %280 : vector<8x64xf32>
    %282 = math.tanh %281 : vector<8x64xf32>
    %283 = arith.mulf %278, %282 : vector<8x64xf32>
    %284 = vector.broadcast %257 : i32 to vector<1x64xi32>
    %285 = vector.broadcast %c6_i32 : i32 to vector<1x64xi32>
    %286 = arith.select %31, %284, %285 : vector<1x64xi1>, vector<1x64xi32>
    %287 = vector.broadcast %9 : vector<8x1xi32> to vector<8x64xi32>
    %288 = vector.broadcast %286 : vector<1x64xi32> to vector<8x64xi32>
    %289 = arith.cmpi sgt, %287, %288 : vector<8x64xi32>
    %290 = arith.select %289, %283, %253 : vector<8x64xi1>, vector<8x64xf32>
    %291 = arith.select %289, %281, %254 : vector<8x64xi1>, vector<8x64xf32>
    %292 = arith.maximumf %256, %283 : vector<8x64xf32>
    %293 = arith.select %289, %292, %256 : vector<8x64xi1>, vector<8x64xf32>
    %c7_i32_70 = arith.constant 7 : i32
    %c7_i32_71 = arith.constant 7 : i32
    %294 = arith.subi %c7_i32_71, %c7_i32_70 : i32
    %c8_i32_72 = arith.constant 8 : i32
    %295 = arith.muli %294, %c8_i32_72 : i32
    %296 = arith.index_cast %295 : i32 to index
    %c0_73 = arith.constant 0 : index
    %297 = vector.load %arg18[%296, %c0_73] : memref<64x256xf32, #tpu.memory_space<vmem>>, vector<8x256xf32>
    %c8_i32_74 = arith.constant 8 : i32
    %298 = arith.muli %c7_i32_70, %c8_i32_74 : i32
    %299 = arith.index_cast %298 : i32 to index
    %c0_75 = arith.constant 0 : index
    %300 = vector.load %arg18[%299, %c0_75] : memref<64x256xf32, #tpu.memory_space<vmem>>, vector<8x256xf32>
    %301 = vector.shape_cast %28 : vector<1x256xi1> to vector<1x256xi1>
    %302 = vector.broadcast %301 : vector<1x256xi1> to vector<8x256xi1>
    %303 = arith.select %302, %297, %300 : vector<8x256xi1>, vector<8x256xf32>
    %cst_76 = arith.constant dense<0.000000e+00> : vector<8x256xf32>
    %304 = tpu.matmul %290, %8, %cst_76 {dimension_numbers = #tpu.dot_dimension_numbers<[1], [0], [0], [1], [0, 0, 1, 1], [], []>} : vector<8x64xf32>, vector<64x256xf32>, vector<8x256xf32> -> vector<8x256xf32>
    %305 = arith.addf %303, %304 : vector<8x256xf32>
    %306 = arith.negf %305 : vector<8x256xf32>
    %307 = math.exp %306 : vector<8x256xf32>
    %cst_77 = arith.constant 1.000000e+00 : f32
    %308 = vector.broadcast %cst_77 : f32 to vector<8x256xf32>
    %309 = arith.addf %308, %307 : vector<8x256xf32>
    %310 = arith.divf %308, %309 : vector<8x256xf32>
    %311 = math.tanh %305 : vector<8x256xf32>
    %312 = vector.extract_strided_slice %310 {offsets = [0, 0], sizes = [8, 64], strides = [1, 1]} : vector<8x256xf32> to vector<8x64xf32>
    %313 = vector.extract_strided_slice %310 {offsets = [0, 64], sizes = [8, 64], strides = [1, 1]} : vector<8x256xf32> to vector<8x64xf32>
    %314 = vector.extract_strided_slice %311 {offsets = [0, 128], sizes = [8, 64], strides = [1, 1]} : vector<8x256xf32> to vector<8x64xf32>
    %315 = vector.extract_strided_slice %310 {offsets = [0, 192], sizes = [8, 64], strides = [1, 1]} : vector<8x256xf32> to vector<8x64xf32>
    %316 = arith.mulf %313, %291 : vector<8x64xf32>
    %317 = arith.mulf %312, %314 : vector<8x64xf32>
    %318 = arith.addf %316, %317 : vector<8x64xf32>
    %319 = math.tanh %318 : vector<8x64xf32>
    %320 = arith.mulf %315, %319 : vector<8x64xf32>
    %321 = vector.broadcast %294 : i32 to vector<1x64xi32>
    %322 = vector.broadcast %c7_i32_70 : i32 to vector<1x64xi32>
    %323 = arith.select %31, %321, %322 : vector<1x64xi1>, vector<1x64xi32>
    %324 = vector.broadcast %9 : vector<8x1xi32> to vector<8x64xi32>
    %325 = vector.broadcast %323 : vector<1x64xi32> to vector<8x64xi32>
    %326 = arith.cmpi sgt, %324, %325 : vector<8x64xi32>
    %327 = arith.select %326, %320, %290 : vector<8x64xi1>, vector<8x64xf32>
    %328 = arith.select %326, %318, %291 : vector<8x64xi1>, vector<8x64xf32>
    %329 = arith.maximumf %293, %320 : vector<8x64xf32>
    %330 = arith.select %326, %329, %293 : vector<8x64xi1>, vector<8x64xf32>
    %c8_i32_78 = arith.constant 8 : i32
    %c0_79 = arith.constant 0 : index
    %c0_80 = arith.constant 0 : index
    %331 = vector.load %arg3[%c0_79, %c0_80] : memref<8x1xi32, #tpu.memory_space<vmem>>, vector<8x1xi32>
    %c0_i32_81 = arith.constant 0 : i32
    %332 = vector.broadcast %c0_i32_81 : i32 to vector<8x1xi32>
    %333 = arith.cmpi sgt, %331, %332 : vector<8x1xi32>
    %cst_82 = arith.constant 0.000000e+00 : f32
    %334 = vector.broadcast %cst_82 : f32 to vector<8x64xf32>
    %335 = arith.maximumf %330, %334 : vector<8x64xf32>
    %336 = vector.shape_cast %333 : vector<8x1xi1> to vector<8x1xi1>
    %337 = vector.broadcast %336 : vector<8x1xi1> to vector<8x64xi1>
    %338 = arith.select %337, %335, %330 : vector<8x64xi1>, vector<8x64xf32>
    %c0_83 = arith.constant 0 : index
    %c0_84 = arith.constant 0 : index
    %339 = vector.load %arg9[%c0_83, %c0_84] : memref<64x32xf32, #tpu.memory_space<vmem>>, vector<64x32xf32>
    %cst_85 = arith.constant dense<0.000000e+00> : vector<8x32xf32>
    %340 = tpu.matmul %338, %339, %cst_85 {dimension_numbers = #tpu.dot_dimension_numbers<[1], [0], [0], [1], [0, 0, 1, 1], [], []>} : vector<8x64xf32>, vector<64x32xf32>, vector<8x32xf32> -> vector<8x32xf32>
    %c0_86 = arith.constant 0 : index
    %c0_87 = arith.constant 0 : index
    %341 = vector.load %arg10[%c0_86, %c0_87] : memref<1x32xf32, #tpu.memory_space<vmem>>, vector<1x32xf32>
    %342 = vector.broadcast %341 : vector<1x32xf32> to vector<8x32xf32>
    %343 = arith.addf %340, %342 : vector<8x32xf32>
    %344 = math.tanh %343 : vector<8x32xf32>
    %c0_88 = arith.constant 0 : index
    %c0_89 = arith.constant 0 : index
    %345 = vector.load %arg11[%c0_88, %c0_89] : memref<8x50xf32, #tpu.memory_space<vmem>>, vector<8x50xf32>
    %c0_90 = arith.constant 0 : index
    %c0_91 = arith.constant 0 : index
    %346 = vector.load %arg12[%c0_90, %c0_91] : memref<50x50xf32, #tpu.memory_space<vmem>>, vector<50x50xf32>
    %cst_92 = arith.constant dense<0.000000e+00> : vector<8x50xf32>
    %347 = tpu.matmul %345, %346, %cst_92 {dimension_numbers = #tpu.dot_dimension_numbers<[1], [0], [0], [1], [0, 0, 1, 1], [], []>} : vector<8x50xf32>, vector<50x50xf32>, vector<8x50xf32> -> vector<8x50xf32>
    %c0_93 = arith.constant 0 : index
    %c0_94 = arith.constant 0 : index
    %348 = vector.load %arg13[%c0_93, %c0_94] : memref<1x50xf32, #tpu.memory_space<vmem>>, vector<1x50xf32>
    %349 = vector.broadcast %348 : vector<1x50xf32> to vector<8x50xf32>
    %350 = arith.addf %347, %349 : vector<8x50xf32>
    %351 = math.tanh %350 : vector<8x50xf32>
    %c0_95 = arith.constant 0 : index
    %c0_96 = arith.constant 0 : index
    %352 = vector.load %arg14[%c0_95, %c0_96] : memref<32x16xf32, #tpu.memory_space<vmem>>, vector<32x16xf32>
    %cst_97 = arith.constant dense<0.000000e+00> : vector<8x16xf32>
    %353 = tpu.matmul %344, %352, %cst_97 {dimension_numbers = #tpu.dot_dimension_numbers<[1], [0], [0], [1], [0, 0, 1, 1], [], []>} : vector<8x32xf32>, vector<32x16xf32>, vector<8x16xf32> -> vector<8x16xf32>
    %c0_98 = arith.constant 0 : index
    %c0_99 = arith.constant 0 : index
    %354 = vector.load %arg15[%c0_98, %c0_99] : memref<50x16xf32, #tpu.memory_space<vmem>>, vector<50x16xf32>
    %cst_100 = arith.constant dense<0.000000e+00> : vector<8x16xf32>
    %355 = tpu.matmul %351, %354, %cst_100 {dimension_numbers = #tpu.dot_dimension_numbers<[1], [0], [0], [1], [0, 0, 1, 1], [], []>} : vector<8x50xf32>, vector<50x16xf32>, vector<8x16xf32> -> vector<8x16xf32>
    %356 = arith.addf %353, %355 : vector<8x16xf32>
    %c0_101 = arith.constant 0 : index
    %c0_102 = arith.constant 0 : index
    %357 = vector.load %arg16[%c0_101, %c0_102] : memref<1x16xf32, #tpu.memory_space<vmem>>, vector<1x16xf32>
    %358 = vector.broadcast %357 : vector<1x16xf32> to vector<8x16xf32>
    %359 = arith.addf %356, %358 : vector<8x16xf32>
    %360 = math.tanh %359 : vector<8x16xf32>
    %c0_103 = arith.constant 0 : index
    %c0_104 = arith.constant 0 : index
    %361 = vector.load %arg17[%c0_103, %c0_104] : memref<8x16xf32, #tpu.memory_space<vmem>>, vector<8x16xf32>
    tpu.vector_store %arg17[%c0_103, %c0_104], %360 {strides = array<i32>} : memref<8x16xf32, #tpu.memory_space<vmem>>, vector<8x16xf32>,
    return
  }
  func.func @transform_0(%arg0: i32) -> (i32, i32, i32) {
    %c0_i32 = arith.constant 0 : i32
    %c0_i32_0 = arith.constant 0 : i32
    %c0_i32_1 = arith.constant 0 : i32
    return %arg0, %c0_i32, %c0_i32_0 : i32, i32, i32
  }
  func.func @transform_1(%arg0: i32) -> (i32, i32) {
    %c0_i32 = arith.constant 0 : i32
    %c0_i32_0 = arith.constant 0 : i32
    return %arg0, %c0_i32 : i32, i32
  }
  func.func @transform_2(%arg0: i32) -> (i32, i32) {
    %c0_i32 = arith.constant 0 : i32
    %c0_i32_0 = arith.constant 0 : i32
    return %arg0, %c0_i32 : i32, i32
  }
  func.func @transform_3(%arg0: i32) -> (i32, i32) {
    %c0_i32 = arith.constant 0 : i32
    %c0_i32_0 = arith.constant 0 : i32
    return %arg0, %c0_i32 : i32, i32
  }
  func.func @transform_4(%arg0: i32) -> (i32, i32) {
    %c0_i32 = arith.constant 0 : i32
    %c0_i32_0 = arith.constant 0 : i32
    return %arg0, %c0_i32 : i32, i32
  }
  func.func @transform_5(%arg0: i32) -> (i32, i32) {
    %c0_i32 = arith.constant 0 : i32
    %c0_i32_0 = arith.constant 0 : i32
    %c0_i32_1 = arith.constant 0 : i32
    return %c0_i32, %c0_i32_0 : i32, i32
  }
  func.func @transform_6(%arg0: i32) -> (i32, i32) {
    %c0_i32 = arith.constant 0 : i32
    %c0_i32_0 = arith.constant 0 : i32
    %c0_i32_1 = arith.constant 0 : i32
    return %c0_i32, %c0_i32_0 : i32, i32
  }
  func.func @transform_7(%arg0: i32) -> (i32, i32) {
    %c0_i32 = arith.constant 0 : i32
    %c0_i32_0 = arith.constant 0 : i32
    %c0_i32_1 = arith.constant 0 : i32
    return %c0_i32, %c0_i32_0 : i32, i32
  }
  func.func @transform_8(%arg0: i32) -> (i32, i32) {
    %c0_i32 = arith.constant 0 : i32
    %c0_i32_0 = arith.constant 0 : i32
    %c0_i32_1 = arith.constant 0 : i32
    return %c0_i32, %c0_i32_0 : i32, i32
  }
  func.func @transform_9(%arg0: i32) -> (i32, i32) {
    %c0_i32 = arith.constant 0 : i32
    %c0_i32_0 = arith.constant 0 : i32
    %c0_i32_1 = arith.constant 0 : i32
    return %c0_i32, %c0_i32_0 : i32, i32
  }
  func.func @transform_10(%arg0: i32) -> (i32, i32) {
    %c0_i32 = arith.constant 0 : i32
    %c0_i32_0 = arith.constant 0 : i32
    return %arg0, %c0_i32 : i32, i32
  }
  func.func @transform_11(%arg0: i32) -> (i32, i32) {
    %c0_i32 = arith.constant 0 : i32
    %c0_i32_0 = arith.constant 0 : i32
    %c0_i32_1 = arith.constant 0 : i32
    return %c0_i32, %c0_i32_0 : i32, i32
  }
  func.func @transform_12(%arg0: i32) -> (i32, i32) {
    %c0_i32 = arith.constant 0 : i32
    %c0_i32_0 = arith.constant 0 : i32
    %c0_i32_1 = arith.constant 0 : i32
    return %c0_i32, %c0_i32_0 : i32, i32
  }
  func.func @transform_13(%arg0: i32) -> (i32, i32) {
    %c0_i32 = arith.constant 0 : i32
    %c0_i32_0 = arith.constant 0 : i32
    %c0_i32_1 = arith.constant 0 : i32
    return %c0_i32, %c0_i32_0 : i32, i32
  }
  func.func @transform_14(%arg0: i32) -> (i32, i32) {
    %c0_i32 = arith.constant 0 : i32
    %c0_i32_0 = arith.constant 0 : i32
    %c0_i32_1 = arith.constant 0 : i32
    return %c0_i32, %c0_i32_0 : i32, i32
  }
  func.func @transform_15(%arg0: i32) -> (i32, i32) {
    %c0_i32 = arith.constant 0 : i32
    %c0_i32_0 = arith.constant 0 : i32
    %c0_i32_1 = arith.constant 0 : i32
    return %c0_i32, %c0_i32_0 : i32, i32
  }
  func.func @transform_16(%arg0: i32) -> (i32, i32) {
    %c0_i32 = arith.constant 0 : i32
    %c0_i32_0 = arith.constant 0 : i32
    return %arg0, %c0_i32 : i32, i32
  }
}

</mosaic_0001>

<bundles_post_ra>
// kernel: wde_rnn_encoder_forward.1
= control target key start
LH: loop header
LB: loop body
LE: loop exit
PB: predicated region body
PF: predicated region fallthrough
CT: control target
= control target key end

     0   :  { %v1862_v3 = vmov 0.0   ;;  %vm81_vm0 = vcmask 261120   ;;  %s1863_s21 = smov 64   ;;  %vm294_vm1 = vcmask 523264   ;;  %v2670_v35 = vmov 0   ;;  %s2652_s5 = inlined_call_operand.vmem [shape: f32[32,256], index: 5, kind: input, shape index: {}]   ;;  %s2653_s7 = inlined_call_operand.vmem [shape: f32[64,256], index: 7, kind: input, shape index: {}]   ;;  %s2654_s0 = inlined_call_operand.vmem [shape: f32[1,64,32], index: 0, kind: input, shape index: {}]   ;;  %s2655_s4 = inlined_call_operand.vmem [shape: f32[8,64], index: 4, kind: input, shape index: {}]   ;;  %s2656_s3 = inlined_call_operand.vmem [shape: f32[8,64], index: 3, kind: input, shape index: {}]   ;;  %s2657_s1 = inlined_call_operand.vmem [shape: s32[8,1], index: 1, kind: input, shape index: {}]   ;;  %s2658_s6 = inlined_call_operand.vmem [shape: f32[1,256], index: 6, kind: input, shape index: {}]   ;;  %s2659_s2 = inlined_call_operand.vmem [shape: s32[8,1], index: 2, kind: input, shape index: {}]   ;;  %s2660_s8 = inlined_call_operand.vmem [shape: f32[64,32], index: 8, kind: input, shape index: {}]   ;;  %s2661_s11 = inlined_call_operand.vmem [shape: f32[50,50], index: 11, kind: input, shape index: {}]   ;;  %s2662_s10 = inlined_call_operand.vmem [shape: f32[8,50], index: 10, kind: input, shape index: {}]   ;;  %s2663_s12 = inlined_call_operand.vmem [shape: f32[1,50], index: 12, kind: input, shape index: {}]   ;;  %s2664_s14 = inlined_call_operand.vmem [shape: f32[50,16], index: 14, kind: input, shape index: {}]   ;;  %s2665_s13 = inlined_call_operand.vmem [shape: f32[32,16], index: 13, kind: input, shape index: {}]   ;;  %s2666_s9 = inlined_call_operand.vmem [shape: f32[1,32], index: 9, kind: input, shape index: {}]   ;;  %s2667_s15 = inlined_call_operand.vmem [shape: f32[1,16], index: 15, kind: input, shape index: {}]   ;;  %s2668_s16 = inlined_call_operand.vmem [shape: f32[8,16], index: 16, kind: output, shape index: {}]  }
   0x1   :  { %2671 = sst [smem:[#allocation3_spill]] %s2652_s5  ;;  %170 = vmatprep.mubr.f32.mxu0 %v1862_v3  ;;  %362 = vmatprep.mubr.f32.mxu1 %v1862_v3  ;;  %v1984_v8 = vld [vmem:[%s2653_s7 + $0x78] sm:$0xff]  ;;  %v1989_v9 = vld [vmem:[%s2653_s7 + $0x70] sm:$0xff]  ;;  %v1994_v10 = vld [vmem:[%s2653_s7 + $0x68] sm:$0xff]  ;;  %v71_v37 = vlaneseq  ;;  %vm1362_vm13 = vcmask 1041408   ;;  %vm1358_vm14 = vcmask 408576  }
   0x2   :  { %s2672_s23 = sld [smem:[#allocation3_spill]]  ;;  %314 = vmatprep.subr.mxu1 %v1984_v8  ;;  %v2003_v12 = vld [vmem:[%s2653_s7 + $0x60] sm:$0xff]  ;;  %v2012_v14 = vld [vmem:[%s2653_s7 + $0x58] sm:$0xff]  ;;  %v2018_v15 = vld [vmem:[%s2653_s7 + $0x50] sm:$0xff]  ;;  %1758 = vset.pattern.permute.xlu1 %v2670_v35  ;;  %vm1871_vm15 = vmmov 0  }
   0x3   :  { %v53_v13 = vld [vmem:[%s2654_s0] sm:$0xff]  ;;  %315 = vmatpush1.msra.mxu1 %v1989_v9  ;;  %v2024_v16 = vld [vmem:[%s2653_s7 + $0x48] sm:$0xff]  ;;  %v2041_v19 = vld [vmem:[%s2653_s7 + $0x38] sm:$0xff]  ;;  %1759 = vset.pattern.permute.xlu0 %v2670_v35  ;;  %v72_v38 = vshrl.u32 %v71_v37, 7  ;;  %v2179_v49 = vand.u32 127, %v71_v37 }
   0x4   :  { %316 = vmatprep.subr.mxu1 %v1994_v10  ;;  %v2031_v17 = vld [vmem:[%s2653_s7 + $0x40] sm:$0xff]  ;;  %v54_v18 = vld [vmem:[%s2654_s0 + $0x8] sm:$0xff]  ;;  %v2047_v20 = vld [vmem:[%s2653_s7 + $0x30] sm:$0xff] }
   0x5   :  { %317 = vmatpush1.msra.mxu1 %v2003_v12  ;;  %v2052_v21 = vld [vmem:[%s2655_s4] sm:$0xff]  ;;  %v2059_v22 = vld [vmem:[%s2653_s7 + $0x28] sm:$0xff]  ;;  %v55_v24 = vld [vmem:[%s2654_s0 + $0x10] sm:$0xff]  ;;  %v73_v39 = vsub.s32 0, %v72_v38  ;;  %v77_v42 = vsub.s32 1, %v72_v38  ;;  %v254_v54 = vadd.s32 128, %v2179_v49 }
   0x6   :  { %318 = vmatprep.subr.mxu1 %v2012_v14  ;;  %385 = vrot.lane.b32.xlu0 %v2052_v21, %s1863_s21  ;;  %v2068_v23 = vld [vmem:[%s2653_s7 + $0x20] sm:$0xff]  ;;  %v2078_v25 = vld [vmem:[%s2653_s7 + $0x18] sm:$0xff]  ;;  %v2084_v26 = vld [vmem:[%s2653_s7 + $0x10] sm:$0xff]  ;;  %v259_v57 = vand.u32 63, %v2179_v49  ;;  %vm281_vm4 = vcmp.ge.s32.totalorder %v2179_v49, 32 }
   0x7   :  { %319 = vmatpush1.msra.mxu1 %v2018_v15  ;;  %v2091_v27 = vld [vmem:[%s2653_s7 + $0x8] sm:$0xff]  ;;  %v2099_v28 = vld [vmem:[%s2653_s7] sm:$0xff]  ;;  %v56_v29 = vld [vmem:[%s2654_s0 + $0x18] sm:$0xff]  ;;  %v266_v60 = vand.u32 63, %v254_v54 }
   0x8   :  { %v68_v0 = vld [vmem:[%s2672_s23 + $0x38] sm:$0xff]  ;;  %v67_v1 = vld [vmem:[%s2672_s23 + $0x30] sm:$0xff]  ;;  %v66_v2 = vld [vmem:[%s2672_s23 + $0x28] sm:$0xff]  ;;  %320 = vmatprep.subr.mxu1 %v2024_v16  ;;  %vm2193_vm2 = vcmp.ge.s32.totalorder %v259_v57, 32 }
   0x9   :  { %130 = vmatprep.subr.mxu0 %v68_v0  ;;  %v65_v4 = vld [vmem:[%s2672_s23 + $0x20] sm:$0xff]  ;;  %v64_v5 = vld [vmem:[%s2672_s23 + $0x18] sm:$0xff]  ;;  %v63_v6 = vld [vmem:[%s2672_s23 + $0x10] sm:$0xff]  ;;  %321 = vmatpush1.msra.mxu1 %v2031_v17  ;;  %vm2199_vm3 = vcmp.ge.s32.totalorder %v266_v60, 32 }
   0xa   :  { %131 = vmatpush1.msra.mxu0 %v67_v1  ;;  %v62_v7 = vld [vmem:[%s2672_s23 + $0x8] sm:$0xff]  ;;  %v61_v11 = vld [vmem:[%s2672_s23] sm:$0xff]  ;;  %322 = vmatprep.subr.mxu1 %v2041_v19  ;;  %v59_v33 = vld [vmem:[%s2654_s0 + $0x30] sm:$0xff] }
   0xb   :  { %132 = vmatprep.subr.mxu0 %v66_v2  ;;  %323 = vmatpush1.msra.mxu1 %v2047_v20  ;;  %v2109_v30 = vld [vmem:[%s2656_s3] sm:$0xff]  ;;  %v58_v32 = vld [vmem:[%s2654_s0 + $0x28] sm:$0xff]  ;;  %v60_v34 = vld [vmem:[%s2654_s0 + $0x38] sm:$0xff] }
   0xc   :  { %133 = vmatpush1.msra.mxu0 %v65_v4  ;;  %324 = vmatprep.subr.mxu1 %v2059_v22  ;;  %v57_v31 = vld [vmem:[%s2654_s0 + $0x20] sm:$0xff]  ;;  %v1350_v2 = vld [vmem:[%s2661_s11 + $0x30] sm:$0x3] }
   0xd   :  { %134 = vmatprep.subr.mxu0 %v64_v5  ;;  %325 = vmatpush1.msra.mxu1 %v2068_v23  ;;  %v251_v36 = vld [vmem:[%s2657_s1] sm:$0xff] }
   0xe   :  { %135 = vmatpush1.msra.mxu0 %v63_v6  ;;  %326 = vmatprep.subr.mxu1 %v2078_v25  ;;  %v69_v40 = vld [vmem:[%s2658_s6] sm:$0x3] }
   0xf   :  { %136 = vmatprep.subr.mxu0 %v62_v7  ;;  %327 = vmatpush1.msra.mxu1 %v2084_v26  ;;  %v74_v44 = vrot.slane %v69_v40, %v73_v39  ;;  %v78_v46 = vrot.slane %v69_v40, %v77_v42  ;;  %v1646_v49 = vld [vmem:[%s2663_s12] ss:$0 sm:$0xff] }
  0x10   :  { %137 = vmatpush1.msra.mxu0 %v61_v11  ;;  %328 = vmatprep.subr.mxu1 %v2091_v27 }
  0x11   :  { %1612 = vmatmul.mubr.msk.f32.vlgmr.msra.gmra.mxu0 %vm81_vm0, %v53_v13  ;;  %560 = vmatprep.subr.mxu0 %v1984_v8 }
  0x12   :  { %176 = vmatprep.mubr.f32.mxu0 %v1862_v3  ;;  %561 = vmatpush1.msra.mxu0 %v1989_v9 }
  0x13   :  { %562 = vmatprep.subr.mxu0 %v1994_v10  ;;  %329 = vmatpush1.msra.mxu1 %v2099_v28 }
  0x14   :  { %563 = vmatpush1.msra.mxu0 %v2003_v12  ;;  %1620 = vmatmul.mubr.msk.f32.vlgmr.msra.gmra.mxu1 %vm294_vm1, %v2109_v30 }
  0x15   :  { %1613 = vmatmul.mubr.msk.f32.gmra.mxu0 %vm81_vm0, %v54_v18  ;;  %564 = vmatprep.subr.mxu0 %v2012_v14 }
  0x16   :  { %182 = vmatprep.mubr.f32.mxu0 %v1862_v3  ;;  %438 = vmatprep.subr.mxu1 %v1984_v8 }
  0x17   :  { %439 = vmatpush1.msra.mxu1 %v1989_v9  ;;  %486 = vmatprep.mubr.f32.mxu1 %v1862_v3 }
  0x18   :  { %440 = vmatprep.subr.mxu1 %v1994_v10  ;;  %565 = vmatpush1.msra.mxu0 %v2018_v15 }
  0x19   :  { %1614 = vmatmul.mubr.msk.f32.gmra.mxu0 %vm81_vm0, %v55_v24  ;;  %441 = vmatpush1.msra.mxu1 %v2003_v12 }
  0x1a   :  { %188 = vmatprep.mubr.f32.mxu0 %v1862_v3  ;;  %442 = vmatprep.subr.mxu1 %v2012_v14 }
  0x1b   :  { %443 = vmatpush1.msra.mxu1 %v2018_v15  ;;  %566 = vmatprep.subr.mxu0 %v2024_v16 }
  0x1c   :  { %444 = vmatprep.subr.mxu1 %v2024_v16  ;;  %567 = vmatpush1.msra.mxu0 %v2031_v17 }
  0x1d   :  { %1615 = vmatmul.mubr.msk.f32.gmra.mxu0 %vm81_vm0, %v56_v29  ;;  %445 = vmatpush1.msra.mxu1 %v2031_v17 }
  0x1e   :  { %194 = vmatprep.mubr.f32.mxu0 %v1862_v3  ;;  %446 = vmatprep.subr.mxu1 %v2041_v19 }
  0x1f   :  { %447 = vmatpush1.msra.mxu1 %v2047_v20  ;;  %568 = vmatprep.subr.mxu0 %v2041_v19 }
  0x20   :  { %448 = vmatprep.subr.mxu1 %v2059_v22  ;;  %569 = vmatpush1.msra.mxu0 %v2047_v20 }
  0x21   :  { %1616 = vmatmul.mubr.msk.f32.gmra.mxu0 %vm81_vm0, %v57_v31  ;;  %449 = vmatpush1.msra.mxu1 %v2068_v23 }
  0x22   :  { %200 = vmatprep.mubr.f32.mxu0 %v1862_v3  ;;  %450 = vmatprep.subr.mxu1 %v2078_v25 }
  0x23   :  { %451 = vmatpush1.msra.mxu1 %v2084_v26  ;;  %570 = vmatprep.subr.mxu0 %v2059_v22 }
  0x24   :  { %452 = vmatprep.subr.mxu1 %v2091_v27  ;;  %571 = vmatpush1.msra.mxu0 %v2068_v23 }
  0x25   :  { %1617 = vmatmul.mubr.msk.f32.gmra.mxu0 %vm81_vm0, %v58_v32  ;;  %453 = vmatpush1.msra.mxu1 %v2099_v28 }
  0x26   :  { %206 = vmatprep.mubr.f32.mxu0 %v1862_v3  ;;  %572 = vmatprep.subr.mxu0 %v2078_v25 }
  0x27   :  { %573 = vmatpush1.msra.mxu0 %v2084_v26  ;;  %682 = vmatprep.subr.mxu1 %v1984_v8 }
  0x28   :  { %574 = vmatprep.subr.mxu0 %v2091_v27  ;;  %399 = vperm.xlu1 %1758, %v251_v36  }
  0x29   :  { %1618 = vmatmul.mubr.msk.f32.gmra.mxu0 %vm81_vm0, %v59_v33 }
  0x2a   :  { %212 = vmatprep.mubr.f32.mxu0 %v1862_v3  ;;  %575 = vmatpush1.msra.mxu0 %v2099_v28 }
  0x2b   :  { %800 = vmatprep.subr.mxu0 %v1984_v8 }
  0x2d   :  { %1619 = vmatmul.mubr.msk.f32.gmra.mxu0 %vm81_vm0, %v60_v34 }
  0x2e   :  { %608 = vmatprep.mubr.f32.mxu0 %v1862_v3 }
  0xd1   :  { %v172_v41 = vpop.f32.mrf.mxu0 }
  0xd3   :  { %v174_v43 = vpop.f32.mrf.mxu0 }
  0xd4   :  { %v2265_v57 = vadd.f32 %v174_v43, %v78_v46 }
  0xd5   :  { %v178_v45 = vpop.f32.mrf.mxu0 }
  0xd6   :  { %v2177_v47 = vadd.f32 %v178_v45, %v74_v44 }
  0xd7   :  { %v180_v48 = vpop.f32.mrf.mxu0 }
  0xd8   :  { %v2181_v50 = vadd.f32 %v180_v48, %v78_v46  ;;  %v2253_v48 = vadd.f32 %v172_v41, %v74_v44 }
  0xd9   :  { %v184_v51 = vpop.f32.mrf.mxu0 }
  0xda   :  { %v2183_v52 = vadd.f32 %v184_v51, %v74_v44 }
  0xdb   :  { %v186_v53 = vpop.f32.mrf.mxu0 }
  0xdc   :  { %v2186_v55 = vadd.f32 %v186_v53, %v78_v46 }
  0xdd   :  { %v190_v56 = vpop.f32.mrf.mxu0 }
  0xde   :  { %v2189_v58 = vadd.f32 %v190_v56, %v74_v44 }
  0xdf   :  { %v192_v59 = vpop.f32.mrf.mxu0 }
  0xe0   :  { %v2191_v61 = vadd.f32 %v192_v59, %v78_v46 }
  0xe1   :  { %v196_v62 = vpop.f32.mrf.mxu0 }
  0xe2   :  { %v2197_v0 = vadd.f32 %v196_v62, %v74_v44 }
  0xe3   :  { %v198_v1 = vpop.f32.mrf.mxu0 }
  0xe4   :  { %v2203_v4 = vadd.f32 %v198_v1, %v78_v46  ;;  %v661_v5 = vsel %vm2193_vm2, %v2197_v0, %v2189_v58  ;;  %v779_v6 = vsel %vm2193_vm2, %v2189_v58, %v2197_v0 }
  0xe5   :  { %v202_v7 = vpop.f32.mrf.mxu0 }
  0xe6   :  { %v2213_v11 = vadd.f32 %v202_v7, %v74_v44  ;;  %v662_v13 = vsel %vm2199_vm3, %v2203_v4, %v2191_v61  ;;  %v780_v18 = vsel %vm2199_vm3, %v2191_v61, %v2203_v4 }
  0xe7   :  { %v204_v24 = vpop.f32.mrf.mxu0 }
  0xe8   :  { %v2223_v29 = vadd.f32 %v204_v24, %v78_v46  ;;  %v539_v31 = vsel %vm2193_vm2, %v2213_v11, %v2183_v52  ;;  %v897_v32 = vsel %vm2193_vm2, %v2183_v52, %v2213_v11 }
  0xe9   :  { %v208_v33 = vpop.f32.mrf.mxu0 }
  0xea   :  { %v2233_v34 = vadd.f32 %v208_v33, %v74_v44  ;;  %v540_v36 = vsel %vm2199_vm3, %v2223_v29, %v2186_v55  ;;  %v898_v37 = vsel %vm2199_vm3, %v2186_v55, %v2223_v29 }
  0xeb   :  { %v210_v38 = vpop.f32.mrf.mxu0 }
  0xec   :  { %v2243_v39 = vadd.f32 %v210_v38, %v78_v46  ;;  %v417_v40 = vsel %vm2193_vm2, %v2233_v34, %v2177_v47 }
  0xed   :  { %v214_v45 = vpop.f32.mrf.mxu0 }
  0xee   :  { %v2255_v51 = vadd.f32 %v214_v45, %v74_v44  ;;  %v418_v53 = vsel %vm2199_vm3, %v2243_v39, %v2181_v50  ;;  %v364_v44 = vpop.f32.mrf.mxu1 }
  0xef   :  { %v216_v56 = vpop.f32.mrf.mxu0 }
  0xf0   :  { %v292_v41 = vsel %vm2193_vm2, %v2255_v51, %v2253_v48  ;;  %v2271_v59 = vadd.f32 %v216_v56, %v78_v46  ;;  %v366_v46 = vpop.f32.mrf.mxu1 }
  0xf1   :  { %v369_v62 = vadd.f32 %v364_v44, %v292_v41 }
  0xf2   :  { %v293_v7 = vsel %vm2199_vm3, %v2271_v59, %v2265_v57 }
  0xf3   :  { %v1621_v1 = vmul.f32 -1.442695, %v369_v62  ;;  %v370_v24 = vadd.f32 %v366_v46, %v293_v7 }
  0xf5   :  { %1760 = vpow2.f32 %v1621_v1  ;;  %v1622_v44 = vmul.f32 -1.442695, %v370_v24  ;;  %v386_v1 = vpop.permute.xlu0 %385 }
  0xf6   :  { %1762 = vtanh.f32 %v370_v24  ;;  %v397_v24 = vsel %vm281_vm4, 7, %v2670_v35 }
 0x102   :  { %v1761_v33 = vpop.eup %1760 }
 0x103   :  { %v377_v38 = vadd.f32 1.0, %v1761_v33  ;;  %v1763_v45 = vpop.eup %1762 }
 0x105   :  { %1764 = vrcp.f32 %v377_v38  ;;  %v2289_v38 = vpop.permute.xlu1 %399 }
 0x106   :  { %1766 = vpow2.f32 %v1622_v44  ;;  %vm401_vm5 = vcmp.gt.s32.totalorder %v2289_v38, %v397_v24 }
 0x112   :  { %v1765_v56 = vpop.eup %1764 }
 0x113   :  { %v389_v41 = vmul.f32 %v1765_v56, %v1763_v45  ;;  %v1767_v62 = vpop.eup %1766  ;;  %v388_v60 = vmul.f32 %v1765_v56, %v386_v1 }
 0x114   :  { %v378_v43 = vadd.f32 1.0, %v1767_v62 }
 0x115   :  { %391 = vrot.lane.b32.xlu0 %v389_v41, %s1863_s21 }
 0x116   :  { %1768 = vrcp.f32 %v378_v43 }
 0x123   :  { %v1769_v7 = vpop.eup %1768 }
 0x187   :  { %v392_v54 = vpop.permute.xlu0 %391 }
 0x188   :  { %v394_v42 = vadd.f32 %v392_v54, %v388_v60 }
 0x18a   :  { %1770 = vtanh.f32 %v394_v42  ;;  %408 = vrot.lane.b32.xlu0 %v394_v42, %s1863_s21 }
 0x197   :  { %v1771_v46 = vpop.eup %1770 }
 0x198   :  { %v396_v33 = vmul.f32 %v1771_v46, %v1769_v7 }
 0x19a   :  { %403 = vrot.lane.b32.xlu1 %v396_v33, %s1863_s21 }
 0x1fc   :  { %v409_v54 = vpop.permute.xlu0 %408 }
 0x1fd   :  { %v411_v42 = vsel %vm401_vm5, %v409_v54, %v2052_v21 }
 0x1fe   :  { %509 = vrot.lane.b32.xlu1 %v411_v42, %s1863_s21 }
 0x20c   :  { %v404_v60 = vpop.permute.xlu1 %403 }
 0x20d   :  { %v406_v43 = vsel %vm401_vm5, %v404_v60, %v2109_v30 }
 0x20e   :  { %1623 = vmatmul.mubr.msk.f32.vlgmr.msra.gmra.mxu1 %vm294_vm1, %v406_v43 }
 0x20f   :  { %683 = vmatpush1.msra.mxu1 %v1989_v9  ;;  %730 = vmatprep.mubr.f32.mxu1 %v1862_v3 }
 0x210   :  { %684 = vmatprep.subr.mxu1 %v1994_v10 }
 0x211   :  { %685 = vmatpush1.msra.mxu1 %v2003_v12 }
 0x212   :  { %686 = vmatprep.subr.mxu1 %v2012_v14 }
 0x213   :  { %687 = vmatpush1.msra.mxu1 %v2018_v15 }
 0x214   :  { %688 = vmatprep.subr.mxu1 %v2024_v16 }
 0x215   :  { %689 = vmatpush1.msra.mxu1 %v2031_v17 }
 0x216   :  { %690 = vmatprep.subr.mxu1 %v2041_v19 }
 0x217   :  { %691 = vmatpush1.msra.mxu1 %v2047_v20 }
 0x218   :  { %692 = vmatprep.subr.mxu1 %v2059_v22 }
 0x219   :  { %693 = vmatpush1.msra.mxu1 %v2068_v23 }
 0x21a   :  { %694 = vmatprep.subr.mxu1 %v2078_v25 }
 0x21b   :  { %695 = vmatpush1.msra.mxu1 %v2084_v26 }
 0x21c   :  { %696 = vmatprep.subr.mxu1 %v2091_v27 }
 0x21d   :  { %697 = vmatpush1.msra.mxu1 %v2099_v28 }
 0x21e   :  { %918 = vmatprep.subr.mxu1 %v1984_v8 }
 0x270   :  { %v510_v54 = vpop.permute.xlu1 %509 }
 0x2ce   :  { %v488_v21 = vpop.f32.mrf.mxu1 }
 0x2cf   :  { %v493_v30 = vadd.f32 %v488_v21, %v417_v40 }
 0x2d0   :  { %v490_v56 = vpop.f32.mrf.mxu1 }
 0x2d1   :  { %v1624_v45 = vmul.f32 -1.442695, %v493_v30  ;;  %v494_v41 = vadd.f32 %v490_v56, %v418_v53 }
 0x2d3   :  { %1772 = vpow2.f32 %v1624_v45  ;;  %v1625_v33 = vmul.f32 -1.442695, %v494_v41 }
 0x2d4   :  { %1774 = vtanh.f32 %v494_v41 }
 0x2e0   :  { %v1773_v44 = vpop.eup %1772 }
 0x2e1   :  { %v501_v62 = vadd.f32 1.0, %v1773_v44  ;;  %v1775_v1 = vpop.eup %1774 }
 0x2e3   :  { %1776 = vrcp.f32 %v501_v62  ;;  %v1865_v62 = vmov 1  }
 0x2e4   :  { %1778 = vpow2.f32 %v1625_v33  ;;  %v521_v41 = vsel %vm281_vm4, 6, %v1865_v62 }
 0x2e5   :  { %vm522_vm6 = vcmp.gt.s32.totalorder %v2289_v38, %v521_v41 }
 0x2f0   :  { %v1777_v7 = vpop.eup %1776 }
 0x2f1   :  { %v513_v46 = vmul.f32 %v1777_v7, %v1775_v1  ;;  %v1779_v40 = vpop.eup %1778  ;;  %v512_v30 = vmul.f32 %v1777_v7, %v510_v54  ;;  %v412_v7 = vsel %vm401_vm5, %v404_v60, -inf }
 0x2f2   :  { %v502_v21 = vadd.f32 1.0, %v1779_v40 }
 0x2f3   :  { %515 = vrot.lane.b32.xlu0 %v513_v46, %s1863_s21 }
 0x2f4   :  { %1780 = vrcp.f32 %v502_v21 }
 0x301   :  { %v1781_v53 = vpop.eup %1780 }
 0x365   :  { %v516_v45 = vpop.permute.xlu0 %515 }
 0x366   :  { %v518_v35 = vadd.f32 %v516_v45, %v512_v30 }
 0x368   :  { %1782 = vtanh.f32 %v518_v35  ;;  %529 = vrot.lane.b32.xlu0 %v518_v35, %s1863_s21 }
 0x375   :  { %v1783_v56 = vpop.eup %1782 }
 0x376   :  { %v520_v44 = vmul.f32 %v1783_v56, %v1781_v53 }
 0x378   :  { %524 = vrot.lane.b32.xlu1 %v520_v44, %s1863_s21 }
 0x3da   :  { %v530_v1 = vpop.permute.xlu0 %529 }
 0x3db   :  { %v532_v46 = vsel %vm522_vm6, %v530_v1, %v411_v42 }
 0x3dc   :  { %631 = vrot.lane.b32.xlu1 %v532_v46, %s1863_s21 }
 0x3ea   :  { %v525_v33 = vpop.permute.xlu1 %524 }
 0x3eb   :  { %v527_v35 = vsel %vm522_vm6, %v525_v33, %v406_v43  ;;  %v533_v40 = vmax.f32 %v412_v7, %v525_v33 }
 0x3ec   :  { %1626 = vmatmul.mubr.msk.f32.vlgmr.msra.gmra.mxu0 %vm294_vm1, %v527_v35 }
 0x3ed   :  { %v534_v54 = vsel %vm522_vm6, %v533_v40, %v412_v7  ;;  %801 = vmatpush1.msra.mxu0 %v1989_v9  ;;  %848 = vmatprep.mubr.f32.mxu0 %v1862_v3 }
 0x3ee   :  { %802 = vmatprep.subr.mxu0 %v1994_v10 }
 0x3ef   :  { %803 = vmatpush1.msra.mxu0 %v2003_v12 }
 0x3f0   :  { %804 = vmatprep.subr.mxu0 %v2012_v14 }
 0x3f1   :  { %805 = vmatpush1.msra.mxu0 %v2018_v15 }
 0x3f2   :  { %806 = vmatprep.subr.mxu0 %v2024_v16 }
 0x3f3   :  { %807 = vmatpush1.msra.mxu0 %v2031_v17 }
 0x3f4   :  { %808 = vmatprep.subr.mxu0 %v2041_v19 }
 0x3f5   :  { %809 = vmatpush1.msra.mxu0 %v2047_v20 }
 0x3f6   :  { %810 = vmatprep.subr.mxu0 %v2059_v22 }
 0x3f7   :  { %811 = vmatpush1.msra.mxu0 %v2068_v23 }
 0x3f8   :  { %812 = vmatprep.subr.mxu0 %v2078_v25 }
 0x3f9   :  { %813 = vmatpush1.msra.mxu0 %v2084_v26 }
 0x3fa   :  { %814 = vmatprep.subr.mxu0 %v2091_v27 }
 0x3fb   :  { %815 = vmatpush1.msra.mxu0 %v2099_v28 }
 0x3fc   :  { %1036 = vmatprep.subr.mxu0 %v1984_v8 }
 0x44e   :  { %v632_v41 = vpop.permute.xlu1 %631 }
 0x4ac   :  { %v610_v24 = vpop.f32.mrf.mxu0 }
 0x4ad   :  { %v615_v42 = vadd.f32 %v610_v24, %v539_v31 }
 0x4ae   :  { %v612_v43 = vpop.f32.mrf.mxu0 }
 0x4af   :  { %v1627_v60 = vmul.f32 -1.442695, %v615_v42  ;;  %v616_v21 = vadd.f32 %v612_v43, %v540_v36 }
 0x4b1   :  { %1784 = vpow2.f32 %v1627_v60  ;;  %v1628_v62 = vmul.f32 -1.442695, %v616_v21  ;;  %v1866_v60 = vmov 2  }
 0x4b2   :  { %1786 = vtanh.f32 %v616_v21  ;;  %v643_v43 = vsel %vm281_vm4, 5, %v1866_v60 }
 0x4b3   :  { %vm644_vm7 = vcmp.gt.s32.totalorder %v2289_v38, %v643_v43 }
 0x4be   :  { %v1785_v30 = vpop.eup %1784 }
 0x4bf   :  { %v623_v45 = vadd.f32 1.0, %v1785_v30  ;;  %v1787_v53 = vpop.eup %1786 }
 0x4c1   :  { %1788 = vrcp.f32 %v623_v45 }
 0x4c2   :  { %1790 = vpow2.f32 %v1628_v62 }
 0x4ce   :  { %v1789_v56 = vpop.eup %1788 }
 0x4cf   :  { %v635_v44 = vmul.f32 %v1789_v56, %v1787_v53  ;;  %v1791_v31 = vpop.eup %1790  ;;  %v634_v7 = vmul.f32 %v1789_v56, %v632_v41 }
 0x4d0   :  { %v624_v1 = vadd.f32 1.0, %v1791_v31 }
 0x4d1   :  { %637 = vrot.lane.b32.xlu0 %v635_v44, %s1863_s21 }
 0x4d2   :  { %1792 = vrcp.f32 %v624_v1 }
 0x4df   :  { %v1793_v36 = vpop.eup %1792 }
 0x543   :  { %v638_v33 = vpop.permute.xlu0 %637 }
 0x544   :  { %v640_v40 = vadd.f32 %v638_v33, %v634_v7 }
 0x546   :  { %1794 = vtanh.f32 %v640_v40  ;;  %651 = vrot.lane.b32.xlu0 %v640_v40, %s1863_s21 }
 0x553   :  { %v1795_v24 = vpop.eup %1794 }
 0x554   :  { %v642_v42 = vmul.f32 %v1795_v24, %v1793_v36 }
 0x556   :  { %646 = vrot.lane.b32.xlu1 %v642_v42, %s1863_s21 }
 0x5b8   :  { %v652_v21 = vpop.permute.xlu0 %651 }
 0x5b9   :  { %v654_v30 = vsel %vm644_vm7, %v652_v21, %v532_v46 }
 0x5ba   :  { %753 = vrot.lane.b32.xlu1 %v654_v30, %s1863_s21 }
 0x5c8   :  { %v647_v45 = vpop.permute.xlu1 %646 }
 0x5c9   :  { %v649_v53 = vsel %vm644_vm7, %v647_v45, %v527_v35  ;;  %v655_v56 = vmax.f32 %v534_v54, %v647_v45 }
 0x5ca   :  { %1629 = vmatmul.mubr.msk.f32.vlgmr.msra.gmra.mxu1 %vm294_vm1, %v649_v53 }
 0x5cb   :  { %v656_v44 = vsel %vm644_vm7, %v655_v56, %v534_v54  ;;  %919 = vmatpush1.msra.mxu1 %v1989_v9  ;;  %966 = vmatprep.mubr.f32.mxu1 %v1862_v3  ;;  %v1867_v56 = vmov 3  }
 0x5cc   :  { %920 = vmatprep.subr.mxu1 %v1994_v10 }
 0x5cd   :  { %921 = vmatpush1.msra.mxu1 %v2003_v12 }
 0x5ce   :  { %922 = vmatprep.subr.mxu1 %v2012_v14 }
 0x5cf   :  { %923 = vmatpush1.msra.mxu1 %v2018_v15 }
 0x5d0   :  { %924 = vmatprep.subr.mxu1 %v2024_v16 }
 0x5d1   :  { %925 = vmatpush1.msra.mxu1 %v2031_v17 }
 0x5d2   :  { %926 = vmatprep.subr.mxu1 %v2041_v19 }
 0x5d3   :  { %927 = vmatpush1.msra.mxu1 %v2047_v20 }
 0x5d4   :  { %928 = vmatprep.subr.mxu1 %v2059_v22 }
 0x5d5   :  { %929 = vmatpush1.msra.mxu1 %v2068_v23 }
 0x5d6   :  { %930 = vmatprep.subr.mxu1 %v2078_v25 }
 0x5d7   :  { %931 = vmatpush1.msra.mxu1 %v2084_v26 }
 0x5d8   :  { %932 = vmatprep.subr.mxu1 %v2091_v27 }
 0x5d9   :  { %933 = vmatpush1.msra.mxu1 %v2099_v28 }
 0x5da   :  { %1154 = vmatprep.subr.mxu1 %v1984_v8 }
 0x62c   :  { %v754_v36 = vpop.permute.xlu1 %753 }
 0x68a   :  { %v732_v46 = vpop.f32.mrf.mxu1 }
 0x68b   :  { %v737_v35 = vadd.f32 %v732_v46, %v661_v5  ;;  %v765_v46 = vsel %vm281_vm4, 4, %v1867_v56 }
 0x68c   :  { %v734_v62 = vpop.f32.mrf.mxu1  ;;  %vm766_vm8 = vcmp.gt.s32.totalorder %v2289_v38, %v765_v46 }
 0x68d   :  { %v1630_v54 = vmul.f32 -1.442695, %v737_v35  ;;  %v738_v31 = vadd.f32 %v734_v62, %v662_v13 }
 0x68f   :  { %1796 = vpow2.f32 %v1630_v54  ;;  %v1631_v40 = vmul.f32 -1.442695, %v738_v31 }
 0x690   :  { %1798 = vtanh.f32 %v738_v31 }
 0x69c   :  { %v1797_v41 = vpop.eup %1796 }
 0x69d   :  { %v745_v1 = vadd.f32 1.0, %v1797_v41  ;;  %v1799_v8 = vpop.eup %1798 }
 0x69f   :  { %1800 = vrcp.f32 %v745_v1 }
 0x6a0   :  { %1802 = vpow2.f32 %v1631_v40 }
 0x6ac   :  { %v1801_v7 = vpop.eup %1800 }
 0x6ad   :  { %v757_v33 = vmul.f32 %v1801_v7, %v1799_v8  ;;  %v1803_v5 = vpop.eup %1802  ;;  %v756_v42 = vmul.f32 %v1801_v7, %v754_v36 }
 0x6ae   :  { %v746_v24 = vadd.f32 1.0, %v1803_v5 }
 0x6af   :  { %759 = vrot.lane.b32.xlu0 %v757_v33, %s1863_s21 }
 0x6b0   :  { %1804 = vrcp.f32 %v746_v24 }
 0x6bd   :  { %v1805_v13 = vpop.eup %1804 }
 0x721   :  { %v760_v60 = vpop.permute.xlu0 %759 }
 0x722   :  { %v762_v43 = vadd.f32 %v760_v60, %v756_v42 }
 0x724   :  { %1806 = vtanh.f32 %v762_v43  ;;  %773 = vrot.lane.b32.xlu0 %v762_v43, %s1863_s21 }
 0x731   :  { %v1807_v21 = vpop.eup %1806 }
 0x732   :  { %v764_v45 = vmul.f32 %v1807_v21, %v1805_v13  ;;  %v1868_v21 = vmov 4  }
 0x734   :  { %768 = vrot.lane.b32.xlu1 %v764_v45, %s1863_s21  ;;  %v883_v45 = vsel %vm281_vm4, 3, %v1868_v21 }
 0x735   :  { %vm884_vm9 = vcmp.gt.s32.totalorder %v2289_v38, %v883_v45 }
 0x796   :  { %v774_v35 = vpop.permute.xlu0 %773 }
 0x797   :  { %v776_v54 = vsel %vm766_vm8, %v774_v35, %v654_v30 }
 0x798   :  { %871 = vrot.lane.b32.xlu1 %v776_v54, %s1863_s21 }
 0x7a6   :  { %v769_v62 = vpop.permute.xlu1 %768 }
 0x7a7   :  { %v771_v31 = vsel %vm766_vm8, %v769_v62, %v649_v53  ;;  %v777_v41 = vmax.f32 %v656_v44, %v769_v62 }
 0x7a8   :  { %1632 = vmatmul.mubr.msk.f32.vlgmr.msra.gmra.mxu0 %vm294_vm1, %v771_v31 }
 0x7a9   :  { %v778_v1 = vsel %vm766_vm8, %v777_v41, %v656_v44  ;;  %1037 = vmatpush1.msra.mxu0 %v1989_v9  ;;  %1084 = vmatprep.mubr.f32.mxu0 %v1862_v3 }
 0x7aa   :  { %1038 = vmatprep.subr.mxu0 %v1994_v10 }
 0x7ab   :  { %1039 = vmatpush1.msra.mxu0 %v2003_v12 }
 0x7ac   :  { %1040 = vmatprep.subr.mxu0 %v2012_v14 }
 0x7ad   :  { %1041 = vmatpush1.msra.mxu0 %v2018_v15 }
 0x7ae   :  { %1042 = vmatprep.subr.mxu0 %v2024_v16 }
 0x7af   :  { %1043 = vmatpush1.msra.mxu0 %v2031_v17 }
 0x7b0   :  { %1044 = vmatprep.subr.mxu0 %v2041_v19 }
 0x7b1   :  { %1045 = vmatpush1.msra.mxu0 %v2047_v20 }
 0x7b2   :  { %1046 = vmatprep.subr.mxu0 %v2059_v22 }
 0x7b3   :  { %1047 = vmatpush1.msra.mxu0 %v2068_v23 }
 0x7b4   :  { %1048 = vmatprep.subr.mxu0 %v2078_v25 }
 0x7b5   :  { %1049 = vmatpush1.msra.mxu0 %v2084_v26 }
 0x7b6   :  { %1050 = vmatprep.subr.mxu0 %v2091_v27 }
 0x7b7   :  { %1051 = vmatpush1.msra.mxu0 %v2099_v28 }
 0x7b8   :  { %1683 = vmatprep.subr.mxu0 %v1862_v3 }
 0x868   :  { %v850_v30 = vpop.f32.mrf.mxu0 }
 0x869   :  { %v855_v53 = vadd.f32 %v850_v30, %v779_v6  ;;  %v872_v6 = vpop.permute.xlu1 %871 }
 0x86a   :  { %v852_v8 = vpop.f32.mrf.mxu0 }
 0x86b   :  { %v1633_v44 = vmul.f32 -1.442695, %v855_v53  ;;  %v856_v7 = vadd.f32 %v852_v8, %v780_v18 }
 0x86d   :  { %1808 = vpow2.f32 %v1633_v44  ;;  %v1634_v58 = vmul.f32 -1.442695, %v856_v7 }
 0x86e   :  { %1810 = vtanh.f32 %v856_v7 }
 0x87a   :  { %v1809_v33 = vpop.eup %1808 }
 0x87b   :  { %v863_v40 = vadd.f32 1.0, %v1809_v33  ;;  %v1811_v5 = vpop.eup %1810 }
 0x87d   :  { %1812 = vrcp.f32 %v863_v40  ;;  %v2677_v40 = vsel %vm2193_vm2, %v2177_v47, %v2233_v34 }
 0x87e   :  { %1814 = vpow2.f32 %v1634_v58  ;;  %v2678_v58 = vsel %vm2199_vm3, %v2181_v50, %v2243_v39 }
 0x88a   :  { %v1813_v36 = vpop.eup %1812 }
 0x88b   :  { %v875_v24 = vmul.f32 %v1813_v36, %v1811_v5  ;;  %v1815_v0 = vpop.eup %1814  ;;  %v874_v60 = vmul.f32 %v1813_v36, %v872_v6 }
 0x88c   :  { %v864_v42 = vadd.f32 1.0, %v1815_v0 }
 0x88d   :  { %877 = vrot.lane.b32.xlu0 %v875_v24, %s1863_s21 }
 0x88e   :  { %1816 = vrcp.f32 %v864_v42 }
 0x89b   :  { %v1817_v61 = vpop.eup %1816 }
 0x8ff   :  { %v878_v43 = vpop.permute.xlu0 %877 }
 0x900   :  { %v880_v13 = vadd.f32 %v878_v43, %v874_v60 }
 0x902   :  { %1818 = vtanh.f32 %v880_v13  ;;  %891 = vrot.lane.b32.xlu0 %v880_v13, %s1863_s21 }
 0x90f   :  { %v1819_v4 = vpop.eup %1818 }
 0x910   :  { %v882_v18 = vmul.f32 %v1819_v4, %v1817_v61 }
 0x912   :  { %886 = vrot.lane.b32.xlu1 %v882_v18, %s1863_s21 }
 0x974   :  { %v892_v56 = vpop.permute.xlu0 %891 }
 0x975   :  { %v894_v46 = vsel %vm884_vm9, %v892_v56, %v776_v54 }
 0x976   :  { %989 = vrot.lane.b32.xlu1 %v894_v46, %s1863_s21 }
 0x984   :  { %v887_v35 = vpop.permute.xlu1 %886 }
 0x985   :  { %v889_v62 = vsel %vm884_vm9, %v887_v35, %v771_v31  ;;  %v895_v41 = vmax.f32 %v778_v1, %v887_v35 }
 0x986   :  { %1635 = vmatmul.mubr.msk.f32.vlgmr.msra.gmra.mxu1 %vm294_vm1, %v889_v62 }
 0x987   :  { %v896_v30 = vsel %vm884_vm9, %v895_v41, %v778_v1  ;;  %1155 = vmatpush1.msra.mxu1 %v1989_v9  ;;  %1202 = vmatprep.mubr.f32.mxu1 %v1862_v3 }
 0x988   :  { %1156 = vmatprep.subr.mxu1 %v1994_v10 }
 0x989   :  { %1157 = vmatpush1.msra.mxu1 %v2003_v12 }
 0x98a   :  { %1158 = vmatprep.subr.mxu1 %v2012_v14 }
 0x98b   :  { %1159 = vmatpush1.msra.mxu1 %v2018_v15 }
 0x98c   :  { %1160 = vmatprep.subr.mxu1 %v2024_v16 }
 0x98d   :  { %1161 = vmatpush1.msra.mxu1 %v2031_v17 }
 0x98e   :  { %1162 = vmatprep.subr.mxu1 %v2041_v19 }
 0x98f   :  { %1163 = vmatpush1.msra.mxu1 %v2047_v20 }
 0x990   :  { %1164 = vmatprep.subr.mxu1 %v2059_v22 }
 0x991   :  { %1165 = vmatpush1.msra.mxu1 %v2068_v23 }
 0x992   :  { %1166 = vmatprep.subr.mxu1 %v2078_v25 }
 0x993   :  { %1167 = vmatpush1.msra.mxu1 %v2084_v26 }
 0x994   :  { %1168 = vmatprep.subr.mxu1 %v2091_v27 }
 0x995   :  { %1169 = vmatpush1.msra.mxu1 %v2099_v28 }
 0x996   :  { %1702 = vmatprep.subr.mxu1 %v1862_v3 }
 0x9e8   :  { %v990_v26 = vpop.permute.xlu1 %989 }
 0xa46   :  { %v968_v9 = vpop.f32.mrf.mxu1 }
 0xa47   :  { %v973_v10 = vadd.f32 %v968_v9, %v897_v32  ;;  %v2679_v9 = vmov 0  }
 0xa48   :  { %v970_v14 = vpop.f32.mrf.mxu1 }
 0xa49   :  { %v1636_v12 = vmul.f32 -1.442695, %v973_v10  ;;  %v974_v15 = vadd.f32 %v970_v14, %v898_v37  ;;  %v1869_v37 = vmov 5  }
 0xa4a   :  { %v1001_v54 = vsel %vm281_vm4, 2, %v1869_v37  ;;  %v1257_v37 = vld [vmem:[%s2660_s8 + $0x18] sm:$0xff] }
 0xa4b   :  { %1820 = vpow2.f32 %v1636_v12  ;;  %v1637_v23 = vmul.f32 -1.442695, %v974_v15  ;;  %vm1002_vm10 = vcmp.gt.s32.totalorder %v2289_v38, %v1001_v54  ;;  %v1346_v54 = vld [vmem:[%s2661_s11 + $0x10] sm:$0xff] }
 0xa4c   :  { %1822 = vtanh.f32 %v974_v15 }
 0xa58   :  { %v1821_v16 = vpop.eup %1820 }
 0xa59   :  { %v981_v17 = vadd.f32 1.0, %v1821_v16  ;;  %v1823_v19 = vpop.eup %1822 }
 0xa5b   :  { %1824 = vrcp.f32 %v981_v17 }
 0xa5c   :  { %1826 = vpow2.f32 %v1637_v23 }
 0xa68   :  { %v1825_v20 = vpop.eup %1824 }
 0xa69   :  { %v993_v22 = vmul.f32 %v1825_v20, %v1823_v19  ;;  %v1827_v25 = vpop.eup %1826  ;;  %v992_v28 = vmul.f32 %v1825_v20, %v990_v26  ;;  %v2680_v19 = vsel %vm2193_vm2, %v2253_v48, %v2255_v51  ;;  %v1261_v48 = vld [vmem:[%s2660_s8 + $0x38] sm:$0xff]  ;;  %v1260_v51 = vld [vmem:[%s2660_s8 + $0x30] sm:$0xff] }
 0xa6a   :  { %v982_v27 = vadd.f32 1.0, %v1827_v25  ;;  %v2681_v25 = vsel %vm2199_vm3, %v2265_v57, %v2271_v59  ;;  %v1349_v57 = vld [vmem:[%s2661_s11 + $0x28] sm:$0xff] }
 0xa6b   :  { %995 = vrot.lane.b32.xlu0 %v993_v22, %s1863_s21  ;;  %v1259_v59 = vld [vmem:[%s2660_s8 + $0x28] sm:$0xff] }
 0xa6c   :  { %1828 = vrcp.f32 %v982_v27 }
 0xa79   :  { %v1829_v55 = vpop.eup %1828 }
 0xadd   :  { %v996_v52 = vpop.permute.xlu0 %995 }
 0xade   :  { %v998_v11 = vadd.f32 %v996_v52, %v992_v28 }
 0xae0   :  { %1830 = vtanh.f32 %v998_v11  ;;  %1009 = vrot.lane.b32.xlu0 %v998_v11, %s1863_s21 }
 0xaed   :  { %v1831_v29 = vpop.eup %1830 }
 0xaee   :  { %v1000_v32 = vmul.f32 %v1831_v29, %v1829_v55  ;;  %v1348_v55 = vld [vmem:[%s2661_s11 + $0x20] sm:$0xff] }
 0xaef   :  { %v1258_v29 = vld [vmem:[%s2660_s8 + $0x20] sm:$0xff] }
 0xaf0   :  { %1004 = vrot.lane.b32.xlu1 %v1000_v32, %s1863_s21  ;;  %v1347_v32 = vld [vmem:[%s2661_s11 + $0x18] sm:$0xff] }
 0xb52   :  { %v1010_v31 = vpop.permute.xlu0 %1009 }
 0xb53   :  { %v1012_v1 = vsel %vm1002_vm10, %v1010_v31, %v894_v46  ;;  %v1870_v46 = vmov 6  }
 0xb54   :  { %1107 = vrot.lane.b32.xlu1 %v1012_v1, %s1863_s21  ;;  %v1119_v35 = vsel %vm281_vm4, 1, %v1870_v46  ;;  %v1445_v46 = vld [vmem:[%s2664_s14 + $0x20] sm:$0xff] }
 0xb55   :  { %vm1120_vm11 = vcmp.gt.s32.totalorder %v2289_v38, %v1119_v35  ;;  %v1440_v35 = vld [vmem:[%s2665_s13 + $0x18] sm:$0xff] }
 0xb62   :  { %v1005_v53 = vpop.permute.xlu1 %1004 }
 0xb63   :  { %v1007_v44 = vsel %vm1002_vm10, %v1005_v53, %v889_v62  ;;  %v1013_v8 = vmax.f32 %v896_v30, %v1005_v53  ;;  %v1245_v62 = vld [vmem:[%s2659_s2] sm:$0xff] }
 0xb64   :  { %1638 = vmatmul.mubr.msk.f32.vlgmr.msra.gmra.mxu0 %vm294_vm1, %v1007_v44  ;;  %vm1246_vm12 = vcmp.gt.s32.totalorder %v1245_v62, 0  ;;  %v1439_v62 = vld [vmem:[%s2665_s13 + $0x10] sm:$0xff] }
 0xb65   :  { %v1014_v7 = vsel %vm1002_vm10, %v1013_v8, %v896_v30  ;;  %v1248_v10 = vsel %vm1246_vm12, 1, %v2679_v9  ;;  %1684 = vmatpush3.msra.mxu0 %v1261_v48  ;;  %1699 = vmatprep.mubr.msk.f32.mxu0 %vm1871_vm15, %v1862_v3  ;;  %v1443_v9 = vld [vmem:[%s2664_s14 + $0x10] sm:$0xff] }
 0xb66   :  { %1685 = vmatprep.subr.mxu0 %v1862_v3 }
 0xb67   :  { %1686 = vmatpush3.msra.mxu0 %v1260_v51 }
 0xb68   :  { %1687 = vmatprep.subr.mxu0 %v1862_v3 }
 0xb69   :  { %1688 = vmatpush3.msra.mxu0 %v1259_v59 }
 0xb6a   :  { %1689 = vmatprep.subr.mxu0 %v1862_v3 }
 0xb6b   :  { %1690 = vmatpush3.msra.mxu0 %v1258_v29 }
 0xb6c   :  { %1691 = vmatprep.subr.mxu0 %v1862_v3 }
 0xb6d   :  { %1692 = vmatpush3.msra.mxu0 %v1257_v37 }
 0xb6e   :  { %1693 = vmatprep.subr.mxu0 %v1862_v3 }
 0xbc6   :  { %v1108_v61 = vpop.permute.xlu1 %1107 }
 0xc24   :  { %v1086_v33 = vpop.f32.mrf.mxu0 }
 0xc25   :  { %v1091_v5 = vadd.f32 %v1086_v33, %v2677_v40  ;;  %v1256_v40 = vld [vmem:[%s2660_s8 + $0x10] sm:$0xff] }
 0xc26   :  { %v1088_v24 = vpop.f32.mrf.mxu0  ;;  %1694 = vmatpush3.msra.mxu0 %v1256_v40 }
 0xc27   :  { %v1639_v36 = vmul.f32 -1.442695, %v1091_v5  ;;  %v1092_v0 = vadd.f32 %v1088_v24, %v2678_v58  ;;  %v1345_v5 = vld [vmem:[%s2661_s11 + $0x8] sm:$0xff]  ;;  %1695 = vmatprep.subr.mxu0 %v1862_v3  ;;  %v1344_v24 = vld [vmem:[%s2661_s11] sm:$0xff] }
 0xc28   :  { %v1254_v58 = vld [vmem:[%s2660_s8] sm:$0xff] }
 0xc29   :  { %1832 = vpow2.f32 %v1639_v36  ;;  %v1640_v47 = vmul.f32 -1.442695, %v1092_v0  ;;  %v1255_v36 = vld [vmem:[%s2660_s8 + $0x8] sm:$0xff] }
 0xc2a   :  { %1834 = vtanh.f32 %v1092_v0  ;;  %1696 = vmatpush3.msra.mxu0 %v1255_v36  ;;  %v1343_v0 = vld [vmem:[%s2662_s10] sm:$0xff] }
 0xc2b   :  { %1697 = vmatprep.subr.mxu0 %v1862_v3 }
 0xc2c   :  { %1698 = vmatpush3.msra.mxu0 %v1254_v58 }
 0xc2d   :  { %1719 = vmatprep.subr.mxu0 %v1862_v3 }
 0xc36   :  { %v1833_v6 = vpop.eup %1832 }
 0xc37   :  { %v1099_v42 = vadd.f32 1.0, %v1833_v6  ;;  %v1835_v60 = vpop.eup %1834 }
 0xc39   :  { %1836 = vrcp.f32 %v1099_v42 }
 0xc3a   :  { %1838 = vpow2.f32 %v1640_v47 }
 0xc46   :  { %v1837_v43 = vpop.eup %1836 }
 0xc47   :  { %v1111_v13 = vmul.f32 %v1837_v43, %v1835_v60  ;;  %v1839_v34 = vpop.eup %1838  ;;  %v1110_v18 = vmul.f32 %v1837_v43, %v1108_v61  ;;  %v1872_v43 = vmov 7  }
 0xc48   :  { %v1100_v4 = vadd.f32 1.0, %v1839_v34 }
 0xc49   :  { %1113 = vrot.lane.b32.xlu0 %v1111_v13, %s1863_s21  ;;  %v1237_v13 = vsel %vm281_vm4, 0, %v1872_v43 }
 0xc4a   :  { %1840 = vrcp.f32 %v1100_v4  ;;  %vm1238_vm2 = vcmp.gt.s32.totalorder %v2289_v38, %v1237_v13  ;;  %v1447_v38 = vld [vmem:[%s2664_s14 + $0x30] sm:$0x3] }
 0xc57   :  { %v1841_v50 = vpop.eup %1840 }
 0xcbb   :  { %v1114_v21 = vpop.permute.xlu0 %1113 }
 0xcbc   :  { %v1116_v45 = vadd.f32 %v1114_v21, %v1110_v18 }
 0xcbe   :  { %1842 = vtanh.f32 %v1116_v45  ;;  %1127 = vrot.lane.b32.xlu0 %v1116_v45, %s1863_s21 }
 0xccb   :  { %v1843_v39 = vpop.eup %1842 }
 0xccc   :  { %v1118_v56 = vmul.f32 %v1843_v39, %v1841_v50 }
 0xcce   :  { %1122 = vrot.lane.b32.xlu1 %v1118_v56, %s1863_s21  ;;  %v1446_v56 = vld [vmem:[%s2664_s14 + $0x28] sm:$0xff] }
 0xd30   :  { %v1128_v41 = vpop.permute.xlu0 %1127 }
 0xd31   :  { %v1130_v30 = vsel %vm1120_vm11, %v1128_v41, %v1012_v1  ;;  %v1444_v41 = vld [vmem:[%s2664_s14 + $0x18] sm:$0xff] }
 0xd32   :  { %1225 = vrot.lane.b32.xlu1 %v1130_v30, %s1863_s21  ;;  %v1438_v30 = vld [vmem:[%s2665_s13 + $0x8] sm:$0xff] }
 0xd36   :  { %1250 = vperm.xlu1 %1758, %v1248_v10   ;;  %v1437_v10 = vld [vmem:[%s2665_s13] sm:$0xff] }
 0xd40   :  { %v1123_v12 = vpop.permute.xlu1 %1122 }
 0xd41   :  { %v1125_v14 = vsel %vm1120_vm11, %v1123_v12, %v1007_v44  ;;  %v1131_v15 = vmax.f32 %v1014_v7, %v1123_v12  ;;  %v1442_v12 = vld [vmem:[%s2664_s14 + $0x8] sm:$0xff] }
 0xd42   :  { %1641 = vmatmul.mubr.msk.f32.vlgmr.msra.gmra.mxu1 %vm294_vm1, %v1125_v14  ;;  %v1441_v14 = vld [vmem:[%s2664_s14] sm:$0xff] }
 0xd43   :  { %v2502_v16 = vsel %vm1120_vm11, %v1131_v15, %v1014_v7  ;;  %1703 = vmatpush3.msk.msra.mxu1 %vm1362_vm13, %v1350_v2  ;;  %1716 = vmatprep.mubr.msk.f32.mxu1 %vm1871_vm15, %v1862_v3 }
 0xd44   :  { %1704 = vmatprep.subr.mxu1 %v1862_v3 }
 0xd45   :  { %1705 = vmatpush3.msra.mxu1 %v1349_v57 }
 0xd46   :  { %1706 = vmatprep.subr.mxu1 %v1862_v3 }
 0xd47   :  { %1707 = vmatpush3.msra.mxu1 %v1348_v55 }
 0xd48   :  { %1708 = vmatprep.subr.mxu1 %v1862_v3 }
 0xd49   :  { %1709 = vmatpush3.msra.mxu1 %v1347_v32 }
 0xd4a   :  { %1710 = vmatprep.subr.mxu1 %v1862_v3 }
 0xd4b   :  { %1711 = vmatpush3.msra.mxu1 %v1346_v54 }
 0xd4c   :  { %1712 = vmatprep.subr.mxu1 %v1862_v3 }
 0xd4d   :  { %1713 = vmatpush3.msra.mxu1 %v1345_v5 }
 0xd4e   :  { %1714 = vmatprep.subr.mxu1 %v1862_v3 }
 0xd4f   :  { %1715 = vmatpush3.msra.mxu1 %v1344_v24 }
 0xd50   :  { %1717 = vmatmul.mubr.msk.f32.vlgmr.msra.gmra.mxu1 %vm1358_vm14, %v1343_v0  ;;  %1736 = vmatprep.subr.mxu1 %v1862_v3 }
 0xd51   :  { %1744 = vmatprep.mubr.msk.f32.mxu1 %vm1871_vm15, %v1862_v3  ;;  %1737 = vmatpush3.msra.mxu1 %v1440_v35 }
 0xd52   :  { %1738 = vmatprep.subr.mxu1 %v1862_v3 }
 0xd53   :  { %1739 = vmatpush3.msra.mxu1 %v1439_v62 }
 0xd54   :  { %1740 = vmatprep.subr.mxu1 %v1862_v3 }
 0xd55   :  { %1741 = vmatpush3.msra.mxu1 %v1438_v30 }
 0xd56   :  { %1742 = vmatprep.subr.mxu1 %v1862_v3 }
 0xd57   :  { %1743 = vmatpush3.msra.mxu1 %v1437_v10 }
 0xda4   :  { %v1226_v53 = vpop.permute.xlu1 %1225 }
 0xdb1   :  { %v1251_v61 = vpop.permute.xlu1 %1250 }
 0xdb2   :  { %vm1252_vm3 = vcmp.eq.s32.totalorder %v1251_v61, 1 }
 0xe02   :  { %v1204_v17 = vpop.f32.mrf.mxu1 }
 0xe03   :  { %v1209_v20 = vadd.f32 %v1204_v17, %v2680_v19 }
 0xe04   :  { %v1206_v23 = vpop.f32.mrf.mxu1 }
 0xe05   :  { %v1642_v22 = vmul.f32 -1.442695, %v1209_v20  ;;  %v1210_v26 = vadd.f32 %v1206_v23, %v2681_v25 }
 0xe07   :  { %1844 = vpow2.f32 %v1642_v22  ;;  %v1643_v31 = vmul.f32 -1.442695, %v1210_v26 }
 0xe08   :  { %1846 = vtanh.f32 %v1210_v26 }
 0xe10   :  { %v1432_v45 = vpop.f32.mrf.mxu1 }
 0xe11   :  { %v1433_v50 = vadd.f32 %v1646_v49, %v1432_v45 }
 0xe12   :  { %v1718_v39 = vpop.f32.mrf.mxu1 }
 0xe14   :  { %v1845_v27 = vpop.eup %1844 }
 0xe15   :  { %v1217_v28 = vadd.f32 1.0, %v1845_v27  ;;  %v1847_v52 = vpop.eup %1846 }
 0xe17   :  { %1848 = vrcp.f32 %v1217_v28 }
 0xe18   :  { %1850 = vpow2.f32 %v1643_v31 }
 0xe24   :  { %v1849_v11 = vpop.eup %1848 }
 0xe25   :  { %v1229_v63 = vmul.f32 %v1849_v11, %v1847_v52  ;;  %v1851_v1 = vpop.eup %1850  ;;  %v1228_v8 = vmul.f32 %v1849_v11, %v1226_v53 }
 0xe26   :  { %v1218_v44 = vadd.f32 1.0, %v1851_v1 }
 0xe27   :  { %1231 = vrot.lane.b32.xlu0 %v1229_v63, %s1863_s21 }
 0xe28   :  { %1852 = vrcp.f32 %v1218_v44 }
 0xe35   :  { %v1853_v6 = vpop.eup %1852 }
 0xe99   :  { %v1232_v7 = vpop.permute.xlu0 %1231 }
 0xe9a   :  { %v1234_v33 = vadd.f32 %v1232_v7, %v1228_v8 }
 0xe9c   :  { %1854 = vtanh.f32 %v1234_v33 }
 0xe9d   :  { %1856 = vtanh.f32 %v1433_v50 }
 0xea9   :  { %v1855_v42 = vpop.eup %1854 }
 0xeaa   :  { %v1236_v60 = vmul.f32 %v1855_v42, %v1853_v6  ;;  %v1857_v15 = vpop.eup %1856 }
 0xeac   :  { %1240 = vrot.lane.b32.xlu0 %v1236_v60, %s1863_s21 }
 0xf1e   :  { %v1241_v47 = vpop.permute.xlu0 %1240 }
 0xf1f   :  { %v1243_v34 = vmax.f32 %v2502_v16, %v1241_v47 }
 0xf21   :  { %v1244_v4 = vsel %vm1238_vm2, %v1243_v34, %v2502_v16  ;;  %v1644_v16 = vld [vmem:[%s2666_s9] ss:$0 sm:$0xff] }
 0xf22   :  { %v1247_v18 = vmax.f32 %v1244_v4, 0.0 }
 0xf24   :  { %v1253_v21 = vsel %vm1252_vm3, %v1247_v18, %v1244_v4 }
 0xf25   :  { %1700 = vmatmul.mubr.msk.f32.vlgmr.msra.gmra.mxu0 %vm294_vm1, %v1253_v21  ;;  %vm1606_vm1 = vcmask 130048  }
 0xf26   :  { %1733 = vmatprep.mubr.msk.f32.mxu0 %vm1871_vm15, %v1862_v3  ;;  %1720 = vmatpush3.msk.msra.mxu0 %vm1362_vm13, %v1447_v38 }
 0xf27   :  { %1721 = vmatprep.subr.mxu0 %v1862_v3 }
 0xf28   :  { %1722 = vmatpush3.msra.mxu0 %v1446_v56 }
 0xf29   :  { %1723 = vmatprep.subr.mxu0 %v1862_v3 }
 0xf2a   :  { %1724 = vmatpush3.msra.mxu0 %v1445_v46 }
 0xf2b   :  { %1725 = vmatprep.subr.mxu0 %v1862_v3 }
 0xf2c   :  { %1726 = vmatpush3.msra.mxu0 %v1444_v41 }
 0xf2d   :  { %1727 = vmatprep.subr.mxu0 %v1862_v3 }
 0xf2e   :  { %1728 = vmatpush3.msra.mxu0 %v1443_v9 }
 0xf2f   :  { %1729 = vmatprep.subr.mxu0 %v1862_v3 }
 0xf30   :  { %1730 = vmatpush3.msra.mxu0 %v1442_v12 }
 0xf31   :  { %1731 = vmatprep.subr.mxu0 %v1862_v3  ;;  %v1652_v3 = vld [vmem:[%s2667_s15] ss:$0 sm:$0xff] }
 0xf32   :  { %1732 = vmatpush3.msra.mxu0 %v1441_v14 }
 0xf33   :  { %1734 = vmatmul.mubr.msk.f32.vlgmr.msra.gmra.mxu0 %vm1358_vm14, %v1857_v15 }
 0xfe5   :  { %v1338_v17 = vpop.f32.mrf.mxu0 }
 0xfe6   :  { %v1339_v19 = vadd.f32 %v1644_v16, %v1338_v17 }
 0xfe7   :  { %v1701_v20 = vpop.f32.mrf.mxu0 }
 0xfe8   :  { %1858 = vtanh.f32 %v1339_v19 }
 0xff3   :  { %v1520_v23 = vpop.f32.mrf.mxu0 }
 0xff5   :  { %v1859_v22 = vpop.eup %1858  ;;  %v1735_v25 = vpop.f32.mrf.mxu0 }
 0xff6   :  { %1745 = vmatmul.mubr.msk.f32.vlgmr.msra.gmra.mxu1 %vm81_vm0, %v1859_v22 }
0x10b6   :  { %v1593_v26 = vpop.f32.mrf.mxu1 }
0x10b7   :  { %v1594_v27 = vadd.f32 %v1593_v26, %v1520_v23 }
0x10b8   :  { %v1746_v28 = vpop.f32.mrf.mxu1 }
0x10b9   :  { %v1604_v52 = vadd.f32 %v1652_v3, %v1594_v27 }
0x10bb   :  { %1860 = vtanh.f32 %v1604_v52 }
0x10c8   :  { %v1861_v11 = vpop.eup %1860 }
0x10c9   :  { %1607 = vst.msk [vmem:[%s2668_s16] sm:$0xff] %vm1606_vm1, %v1861_v11 }

</bundles_post_ra>
